<compile_context>
chip_gen: v5e
topology: v5e:2x2
jax: 0.10.0
libtpu: 0.0.40
codegen_flags: <defaults>
</compile_context>

<pallas_src>
import jax
import jax.numpy as jnp
from jax import lax
from jax.experimental import pallas as pl
from jax.experimental.pallas import tpu as pltpu


# -----------------------------------------------------------------------------------
# Fused kernel: EdgeEncoder (2x 3x3 conv) + 2x GraphConvolution.
# Row layout of all per-pair tensors: r = j*S + i (j-major), channels on lanes.
# -----------------------------------------------------------------------------------
def _gcn_fused_kernel(cols1_ref, x_ref, tmask_ref,
                      wc1_ref, wc2_ref, w0_ref, b0_ref, w1_ref, b1_ref,
                      out_ref):
    f32 = jnp.float32
    bt, S, _ = x_ref.shape
    SS = cols1_ref.shape[1]              # S * S
    C0 = wc1_ref.shape[1]                # conv1 output channels (64)
    F = w0_ref.shape[1]                  # packed edge channels / GCN width (96)

    wc1 = wc1_ref[...]                   # (9*Ce, C0)
    wc2 = wc2_ref[...]                   # (9*C0, C1)
    w0 = w0_ref[...]                     # (Fn, F)
    w1 = w1_ref[...]                     # (F, F)
    b0 = b0_ref[...]                     # (1, F)
    b1 = b1_ref[...]                     # (1, F)
    tmask = tmask_ref[...]               # (SS, 9)  conv2 boundary masks, tap k = 3*dy+dx

    pad = S + 1                          # max |row shift| for a 3x3 tap in j-major order
    zrows = jnp.zeros((pad, C0), f32)

    for b in range(bt):
        # ---- conv1: one (SS, 9*Ce) x (9*Ce, C0) matmul on the wrapper im2col ------
        e1 = jnp.dot(cols1_ref[b], wc1, preferred_element_type=f32)        # (SS, C0)

        # ---- conv2: build the (SS, 9*C0) column slab from shifted/masked windows --
        # e1ext[pad + r] = e1[r]; window for tap (dy, dx) reads rows shifted by
        # d = (dx-1)*S + (dy-1); the mask zeroes rows whose source (i+dy-1, j+dx-1)
        # falls outside the S x S grid (== conv zero padding on e1).
        e1ext = jnp.concatenate([zrows, e1, zrows], axis=0)                # (SS+2*pad, C0)
        wins = []
        for dy in range(3):
            for dx in range(3):
                k = 3 * dy + dx
                d = (dx - 1) * S + (dy - 1)
                w = e1ext[pad + d:pad + d + SS, :]                         # (SS, C0)
                wins.append(w * tmask[:, k:k + 1])
        cols2 = jnp.concatenate(wins, axis=-1)                             # (SS, 9*C0)
        e2 = jnp.dot(cols2, wc2, preferred_element_type=f32)               # (SS, C1)

        # Packed edge features (channel order == torch.cat([edge1, edge2], dim=1)).
        e = jnp.concatenate([e1, e2], axis=-1)                             # (SS, F)

        # ---- GraphConvolution 0: out0[i,c] = sum_j e[j*S+i, c] * (x @ W0)[j, c] + b0
        s0 = jnp.dot(x_ref[b], w0, preferred_element_type=f32)             # (S, F)
        out0 = jnp.broadcast_to(b0, (S, F))
        for j in range(S):
            out0 = out0 + e[j * S:(j + 1) * S, :] * s0[j:j + 1, :]

        # ---- GraphConvolution 1 (gcn_layers[:-1] is empty -> no ReLU in between) --
        s1 = jnp.dot(out0, w1, preferred_element_type=f32)                 # (S, F)
        out1 = jnp.broadcast_to(b1, (S, F))
        for j in range(S):
            out1 = out1 + e[j * S:(j + 1) * S, :] * s1[j:j + 1, :]

        out_ref[b] = out1.astype(out_ref.dtype)                            # one 96-lane store


# -----------------------------------------------------------------------------------
# Wrapper: layout plumbing only (im2col for conv1, weight flattening, boundary masks).
# -----------------------------------------------------------------------------------
def gcn_forward(x, edge, params, *, batch_tile=1):
    """GCN.forward with defaults (num_gcn_layers=2, raw_laplacian=False); dropout/ReLU
    are not applied in this configuration.
    x: (B, S, node_feats)   edge: (B, S, S, edge_feats)  ->  (B, S, out_features)."""
    B, S, Fn = x.shape
    Ce = edge.shape[-1]
    C0 = params["conv1_w"].shape[0]
    C1 = params["conv2_w"].shape[0]
    F = params["w0"].shape[1]
    assert C0 + C1 == F
    # The reference GraphConvolution transposes its input iff x.size(-1) != in_features;
    # this implementation covers that (usual) branch only.
    assert S != Fn and S != F, "requires seq_len != in_features for both GCN layers"
    assert B % batch_tile == 0
    f32 = jnp.float32
    SS = S * S

    xf = x.astype(f32)

    # im2col of the raw edge features for conv1, rows ordered r = j*S + i (j-major).
    ep = jnp.pad(edge.astype(f32), ((0, 0), (1, 1), (1, 1), (0, 0)))
    wins = jnp.stack([ep[:, dy:dy + S, dx:dx + S, :]
                      for dy in range(3) for dx in range(3)], axis=3)  # (B, Si, Sj, 9, Ce)
    cols1 = wins.transpose(0, 2, 1, 3, 4).reshape(B, SS, 9 * Ce)       # (B, SS, 9*Ce)

    # Conv tap weights flattened to plain matmul operands, tap k = 3*dy + dx.
    wc1 = jnp.transpose(params["conv1_w"], (2, 3, 1, 0)).reshape(9 * Ce, C0).astype(f32)
    wc2 = jnp.transpose(params["conv2_w"], (2, 3, 1, 0)).reshape(9 * C0, C1).astype(f32)

    w0 = params["w0"].astype(f32)
    w1 = params["w1"].astype(f32)
    b0 = params["b0"].reshape(1, F).astype(f32)
    b1 = params["b1"].reshape(1, F).astype(f32)

    # Boundary masks for conv2's shifted windows of e1 (depend only on S).
    rr = jnp.arange(SS)
    ii, jj = rr % S, rr // S
    tmask = jnp.stack(
        [((ii + dy - 1 >= 0) & (ii + dy - 1 < S) &
          (jj + dx - 1 >= 0) & (jj + dx - 1 < S))
         for dy in range(3) for dx in range(3)], axis=-1).astype(f32)   # (SS, 9)

    def const_spec(shape):
        z = (0,) * len(shape)
        return pl.BlockSpec(shape, lambda g, _z=z: _z)

    bt = batch_tile
    flops = 2 * B * (SS * (9 * Ce) * C0 + SS * (9 * C0) * C1
                     + S * Fn * F + S * F * F + 2 * SS * F)
    bytes_accessed = 4 * (cols1.size + xf.size + tmask.size + wc1.size + wc2.size
                          + w0.size + w1.size + b0.size + b1.size + B * S * F)

    return pl.pallas_call(
        _gcn_fused_kernel,
        grid=(B // bt,),
        in_specs=[
            pl.BlockSpec((bt, SS, 9 * Ce), lambda g: (g, 0, 0)),   # conv1 im2col
            pl.BlockSpec((bt, S, Fn), lambda g: (g, 0, 0)),        # node features
            const_spec((SS, 9)),                                   # conv2 boundary masks
            const_spec((9 * Ce, C0)),                              # conv1 weights
            const_spec((9 * C0, C1)),                              # conv2 weights
            const_spec((Fn, F)), const_spec((1, F)),               # GCN layer-0 W/b
            const_spec((F, F)), const_spec((1, F)),                # GCN layer-1 W/b
        ],
        out_specs=pl.BlockSpec((bt, S, F), lambda g: (g, 0, 0)),
        out_shape=jax.ShapeDtypeStruct((B, S, F), f32),
        compiler_params=pltpu.CompilerParams(dimension_semantics=("parallel",)),
        cost_estimate=pl.CostEstimate(flops=flops, transcendentals=0,
                                      bytes_accessed=bytes_accessed),
    )(cols1, xf, tmask, wc1, wc2, w0, b0, w1, b1)


def init_params(key, node_feats=4, out_features=96, edge_feats=6):
    conv_dim0 = int(out_features / 3 * 2)        # 64
    conv_dim1 = out_features - conv_dim0         # 32
    ks = jax.random.split(key, 6)
    stdv = 1.0 / (out_features ** 0.5)
    return {
        "conv1_w": 0.1 * jax.random.normal(ks[0], (conv_dim0, edge_feats, 3, 3), jnp.float32),
        "conv2_w": 0.1 * jax.random.normal(ks[1], (conv_dim1, conv_dim0, 3, 3), jnp.float32),
        "w0": jax.random.uniform(ks[2], (node_feats, out_features), jnp.float32, -stdv, stdv),
        "b0": jax.random.uniform(ks[3], (out_features,), jnp.float32, -stdv, stdv),
        "w1": jax.random.uniform(ks[4], (out_features, out_features), jnp.float32, -stdv, stdv),
        "b1": jax.random.uniform(ks[5], (out_features,), jnp.float32, -stdv, stdv),
    }


# -----------------------------------------------------------------------------------
# Pure-JAX reference (correctness check only), run at HIGHEST precision.  The kernel
# accumulates in f32 everywhere, but its MXU matmuls may run the default (bf16-pass)
# f32 mode, so the comparison uses a 2e-2 max-normalized tolerance — loose enough for
# either MXU mode, tight enough to catch any layout / indexing error (those are O(1)).
# -----------------------------------------------------------------------------------
def _reference_forward(x, edge, params):
    hi = lax.Precision.HIGHEST
    lap = jnp.transpose(edge, (0, 3, 1, 2))
    conv = lambda a, w: lax.conv_general_dilated(
        a, w, (1, 1), "SAME",
        dimension_numbers=("NCHW", "OIHW", "NCHW"), precision=hi)
    e1 = conv(lap, params["conv1_w"])
    e2 = conv(e1, params["conv2_w"])
    e = jnp.concatenate([e1, e2], axis=1)

    def gc(xb, w, b):
        s = jnp.einsum("bsf,fo->bso", xb, w, precision=hi)     # (B, S, F)
        o = jnp.einsum("bcij,bjc->bci", e, s, precision=hi)    # (B, F, S)
        return o + b[None, :, None]

    o = gc(x, params["w0"], params["b0"])
    o = gc(jnp.transpose(o, (0, 2, 1)), params["w1"], params["b1"])
    return jnp.transpose(o, (0, 2, 1))


# -----------------------------------------------------------------------------------
if __name__ == "__main__":
    key = jax.random.PRNGKey(0)
    kx, ke, kp = jax.random.split(key, 3)
    B, S, node_feats, edge_feats, out_features = 2, 8, 4, 6, 96

    x = jax.random.normal(kx, (B, S, node_feats), jnp.float32)
    edge = jax.random.normal(ke, (B, S, S, edge_feats), jnp.float32)
    params = init_params(kp, node_feats, out_features, edge_feats)

    out = jax.jit(gcn_forward)(x, edge, params)
    out = jax.block_until_ready(out)
    assert out.shape == (B, S, out_features), out.shape

    ref = _reference_forward(x, edge, params)
    err = float(jnp.max(jnp.abs(out - ref)) / (jnp.max(jnp.abs(ref)) + 1e-12))
    assert err < 2e-2, f"max relative error {err}"
    print("KERNEL_OK")
</pallas_src>

<mosaic_0001>
module attributes {stable_mosaic.version = 11 : i64} {
  func.func @_gcn_fused_kernel(%arg0: i32, %arg1: memref<1x64x54xf32, #tpu.memory_space<vmem>>, %arg2: memref<1x8x4xf32, #tpu.memory_space<vmem>>, %arg3: memref<64x9xf32, #tpu.memory_space<vmem>>, %arg4: memref<54x64xf32, #tpu.memory_space<vmem>>, %arg5: memref<576x32xf32, #tpu.memory_space<vmem>>, %arg6: memref<4x96xf32, #tpu.memory_space<vmem>>, %arg7: memref<1x96xf32, #tpu.memory_space<vmem>>, %arg8: memref<96x96xf32, #tpu.memory_space<vmem>>, %arg9: memref<1x96xf32, #tpu.memory_space<vmem>>, %arg10: memref<1x8x96xf32, #tpu.memory_space<vmem>>) attributes {dimension_semantics = [#tpu.dimension_semantics<parallel>], iteration_bounds = array<i64: 2>, scalar_prefetch = 0 : i64, scratch_operands = 0 : i64, tpu.core_type = #tpu.core_type<tc>, window_params = [{transform_indices = @transform_0, window_bounds = array<i64: 1, 64, 54>}, {transform_indices = @transform_1, window_bounds = array<i64: 1, 8, 4>}, {pipeline_mode = #tpu.pipeline_mode<synchronous>, transform_indices = @transform_2, window_bounds = array<i64: 64, 9>}, {pipeline_mode = #tpu.pipeline_mode<synchronous>, transform_indices = @transform_3, window_bounds = array<i64: 54, 64>}, {pipeline_mode = #tpu.pipeline_mode<synchronous>, transform_indices = @transform_4, window_bounds = array<i64: 576, 32>}, {pipeline_mode = #tpu.pipeline_mode<synchronous>, transform_indices = @transform_5, window_bounds = array<i64: 4, 96>}, {pipeline_mode = #tpu.pipeline_mode<synchronous>, transform_indices = @transform_6, window_bounds = array<i64: 1, 96>}, {pipeline_mode = #tpu.pipeline_mode<synchronous>, transform_indices = @transform_7, window_bounds = array<i64: 96, 96>}, {pipeline_mode = #tpu.pipeline_mode<synchronous>, transform_indices = @transform_8, window_bounds = array<i64: 1, 96>}, {transform_indices = @transform_9, window_bounds = array<i64: 1, 8, 96>}]} {
    %c0 = arith.constant 0 : index
    %c0_0 = arith.constant 0 : index
    %0 = vector.load %arg4[%c0, %c0_0] : memref<54x64xf32, #tpu.memory_space<vmem>>, vector<54x64xf32>
    %c0_1 = arith.constant 0 : index
    %c0_2 = arith.constant 0 : index
    %1 = vector.load %arg5[%c0_1, %c0_2] : memref<576x32xf32, #tpu.memory_space<vmem>>, vector<576x32xf32>
    %c0_3 = arith.constant 0 : index
    %c0_4 = arith.constant 0 : index
    %2 = vector.load %arg6[%c0_3, %c0_4] : memref<4x96xf32, #tpu.memory_space<vmem>>, vector<4x96xf32>
    %c0_5 = arith.constant 0 : index
    %c0_6 = arith.constant 0 : index
    %3 = vector.load %arg8[%c0_5, %c0_6] : memref<96x96xf32, #tpu.memory_space<vmem>>, vector<96x96xf32>
    %c0_7 = arith.constant 0 : index
    %c0_8 = arith.constant 0 : index
    %4 = vector.load %arg7[%c0_7, %c0_8] : memref<1x96xf32, #tpu.memory_space<vmem>>, vector<1x96xf32>
    %c0_9 = arith.constant 0 : index
    %c0_10 = arith.constant 0 : index
    %5 = vector.load %arg9[%c0_9, %c0_10] : memref<1x96xf32, #tpu.memory_space<vmem>>, vector<1x96xf32>
    %c0_11 = arith.constant 0 : index
    %c0_12 = arith.constant 0 : index
    %6 = vector.load %arg3[%c0_11, %c0_12] : memref<64x9xf32, #tpu.memory_space<vmem>>, vector<64x9xf32>
    %cst = arith.constant 0.000000e+00 : f32
    %7 = vector.broadcast %cst : f32 to vector<9x64xf32>
    %c0_13 = arith.constant 0 : index
    %c0_14 = arith.constant 0 : index
    %c0_15 = arith.constant 0 : index
    %8 = vector.load %arg1[%c0_13, %c0_14, %c0_15] : memref<1x64x54xf32, #tpu.memory_space<vmem>>, vector<1x64x54xf32>
    %9 = vector.shape_cast %8 : vector<1x64x54xf32> to vector<64x54xf32>
    %cst_16 = arith.constant dense<0.000000e+00> : vector<64x64xf32>
    %10 = tpu.matmul %9, %0, %cst_16 {dimension_numbers = #tpu.dot_dimension_numbers<[1], [0], [0], [1], [0, 0, 1, 1], [], []>} : vector<64x54xf32>, vector<54x64xf32>, vector<64x64xf32> -> vector<64x64xf32>
    %11 = tpu.concatenate %7, %10, %7 in 0 : vector<9x64xf32>, vector<64x64xf32>, vector<9x64xf32> -> vector<82x64xf32>
    %12 = vector.extract_strided_slice %11 {offsets = [0, 0], sizes = [64, 64], strides = [1, 1]} : vector<82x64xf32> to vector<64x64xf32>
    %13 = vector.extract_strided_slice %6 {offsets = [0, 0], sizes = [64, 1], strides = [1, 1]} : vector<64x9xf32> to vector<64x1xf32>
    %14 = vector.broadcast %13 : vector<64x1xf32> to vector<64x64xf32>
    %15 = arith.mulf %12, %14 : vector<64x64xf32>
    %16 = vector.extract_strided_slice %11 {offsets = [8, 0], sizes = [64, 64], strides = [1, 1]} : vector<82x64xf32> to vector<64x64xf32>
    %17 = vector.extract_strided_slice %6 {offsets = [0, 1], sizes = [64, 1], strides = [1, 1]} : vector<64x9xf32> to vector<64x1xf32>
    %18 = vector.broadcast %17 : vector<64x1xf32> to vector<64x64xf32>
    %19 = arith.mulf %16, %18 : vector<64x64xf32>
    %20 = vector.extract_strided_slice %11 {offsets = [16, 0], sizes = [64, 64], strides = [1, 1]} : vector<82x64xf32> to vector<64x64xf32>
    %21 = vector.extract_strided_slice %6 {offsets = [0, 2], sizes = [64, 1], strides = [1, 1]} : vector<64x9xf32> to vector<64x1xf32>
    %22 = vector.broadcast %21 : vector<64x1xf32> to vector<64x64xf32>
    %23 = arith.mulf %20, %22 : vector<64x64xf32>
    %24 = vector.extract_strided_slice %11 {offsets = [1, 0], sizes = [64, 64], strides = [1, 1]} : vector<82x64xf32> to vector<64x64xf32>
    %25 = vector.extract_strided_slice %6 {offsets = [0, 3], sizes = [64, 1], strides = [1, 1]} : vector<64x9xf32> to vector<64x1xf32>
    %26 = vector.broadcast %25 : vector<64x1xf32> to vector<64x64xf32>
    %27 = arith.mulf %24, %26 : vector<64x64xf32>
    %28 = vector.extract_strided_slice %11 {offsets = [9, 0], sizes = [64, 64], strides = [1, 1]} : vector<82x64xf32> to vector<64x64xf32>
    %29 = vector.extract_strided_slice %6 {offsets = [0, 4], sizes = [64, 1], strides = [1, 1]} : vector<64x9xf32> to vector<64x1xf32>
    %30 = vector.broadcast %29 : vector<64x1xf32> to vector<64x64xf32>
    %31 = arith.mulf %28, %30 : vector<64x64xf32>
    %32 = vector.extract_strided_slice %11 {offsets = [17, 0], sizes = [64, 64], strides = [1, 1]} : vector<82x64xf32> to vector<64x64xf32>
    %33 = vector.extract_strided_slice %6 {offsets = [0, 5], sizes = [64, 1], strides = [1, 1]} : vector<64x9xf32> to vector<64x1xf32>
    %34 = vector.broadcast %33 : vector<64x1xf32> to vector<64x64xf32>
    %35 = arith.mulf %32, %34 : vector<64x64xf32>
    %36 = vector.extract_strided_slice %11 {offsets = [2, 0], sizes = [64, 64], strides = [1, 1]} : vector<82x64xf32> to vector<64x64xf32>
    %37 = vector.extract_strided_slice %6 {offsets = [0, 6], sizes = [64, 1], strides = [1, 1]} : vector<64x9xf32> to vector<64x1xf32>
    %38 = vector.broadcast %37 : vector<64x1xf32> to vector<64x64xf32>
    %39 = arith.mulf %36, %38 : vector<64x64xf32>
    %40 = vector.extract_strided_slice %11 {offsets = [10, 0], sizes = [64, 64], strides = [1, 1]} : vector<82x64xf32> to vector<64x64xf32>
    %41 = vector.extract_strided_slice %6 {offsets = [0, 7], sizes = [64, 1], strides = [1, 1]} : vector<64x9xf32> to vector<64x1xf32>
    %42 = vector.broadcast %41 : vector<64x1xf32> to vector<64x64xf32>
    %43 = arith.mulf %40, %42 : vector<64x64xf32>
    %44 = vector.extract_strided_slice %11 {offsets = [18, 0], sizes = [64, 64], strides = [1, 1]} : vector<82x64xf32> to vector<64x64xf32>
    %45 = vector.extract_strided_slice %6 {offsets = [0, 8], sizes = [64, 1], strides = [1, 1]} : vector<64x9xf32> to vector<64x1xf32>
    %46 = vector.broadcast %45 : vector<64x1xf32> to vector<64x64xf32>
    %47 = arith.mulf %44, %46 : vector<64x64xf32>
    %48 = tpu.concatenate %15, %19, %23, %27, %31, %35, %39, %43, %47 in 1 : vector<64x64xf32>, vector<64x64xf32>, vector<64x64xf32>, vector<64x64xf32>, vector<64x64xf32>, vector<64x64xf32>, vector<64x64xf32>, vector<64x64xf32>, vector<64x64xf32> -> vector<64x576xf32>
    %cst_17 = arith.constant dense<0.000000e+00> : vector<64x32xf32>
    %49 = tpu.matmul %48, %1, %cst_17 {dimension_numbers = #tpu.dot_dimension_numbers<[1], [0], [0], [1], [0, 0, 1, 1], [], []>} : vector<64x576xf32>, vector<576x32xf32>, vector<64x32xf32> -> vector<64x32xf32>
    %50 = tpu.concatenate %10, %49 in 1 : vector<64x64xf32>, vector<64x32xf32> -> vector<64x96xf32>
    %c0_18 = arith.constant 0 : index
    %c0_19 = arith.constant 0 : index
    %c0_20 = arith.constant 0 : index
    %51 = vector.load %arg2[%c0_18, %c0_19, %c0_20] : memref<1x8x4xf32, #tpu.memory_space<vmem>>, vector<1x8x4xf32>
    %52 = vector.shape_cast %51 : vector<1x8x4xf32> to vector<8x4xf32>
    %cst_21 = arith.constant dense<0.000000e+00> : vector<8x96xf32>
    %53 = tpu.matmul %52, %2, %cst_21 {dimension_numbers = #tpu.dot_dimension_numbers<[1], [0], [0], [1], [0, 0, 1, 1], [], []>} : vector<8x4xf32>, vector<4x96xf32>, vector<8x96xf32> -> vector<8x96xf32>
    %54 = vector.shape_cast %4 : vector<1x96xf32> to vector<1x96xf32>
    %55 = vector.broadcast %54 : vector<1x96xf32> to vector<8x96xf32>
    %56 = vector.extract_strided_slice %50 {offsets = [0, 0], sizes = [8, 96], strides = [1, 1]} : vector<64x96xf32> to vector<8x96xf32>
    %57 = vector.extract_strided_slice %53 {offsets = [0, 0], sizes = [1, 96], strides = [1, 1]} : vector<8x96xf32> to vector<1x96xf32>
    %58 = vector.broadcast %57 : vector<1x96xf32> to vector<8x96xf32>
    %59 = arith.mulf %56, %58 : vector<8x96xf32>
    %60 = arith.addf %55, %59 : vector<8x96xf32>
    %61 = vector.extract_strided_slice %50 {offsets = [8, 0], sizes = [8, 96], strides = [1, 1]} : vector<64x96xf32> to vector<8x96xf32>
    %62 = vector.extract_strided_slice %53 {offsets = [1, 0], sizes = [1, 96], strides = [1, 1]} : vector<8x96xf32> to vector<1x96xf32>
    %63 = vector.broadcast %62 : vector<1x96xf32> to vector<8x96xf32>
    %64 = arith.mulf %61, %63 : vector<8x96xf32>
    %65 = arith.addf %60, %64 : vector<8x96xf32>
    %66 = vector.extract_strided_slice %50 {offsets = [16, 0], sizes = [8, 96], strides = [1, 1]} : vector<64x96xf32> to vector<8x96xf32>
    %67 = vector.extract_strided_slice %53 {offsets = [2, 0], sizes = [1, 96], strides = [1, 1]} : vector<8x96xf32> to vector<1x96xf32>
    %68 = vector.broadcast %67 : vector<1x96xf32> to vector<8x96xf32>
    %69 = arith.mulf %66, %68 : vector<8x96xf32>
    %70 = arith.addf %65, %69 : vector<8x96xf32>
    %71 = vector.extract_strided_slice %50 {offsets = [24, 0], sizes = [8, 96], strides = [1, 1]} : vector<64x96xf32> to vector<8x96xf32>
    %72 = vector.extract_strided_slice %53 {offsets = [3, 0], sizes = [1, 96], strides = [1, 1]} : vector<8x96xf32> to vector<1x96xf32>
    %73 = vector.broadcast %72 : vector<1x96xf32> to vector<8x96xf32>
    %74 = arith.mulf %71, %73 : vector<8x96xf32>
    %75 = arith.addf %70, %74 : vector<8x96xf32>
    %76 = vector.extract_strided_slice %50 {offsets = [32, 0], sizes = [8, 96], strides = [1, 1]} : vector<64x96xf32> to vector<8x96xf32>
    %77 = vector.extract_strided_slice %53 {offsets = [4, 0], sizes = [1, 96], strides = [1, 1]} : vector<8x96xf32> to vector<1x96xf32>
    %78 = vector.broadcast %77 : vector<1x96xf32> to vector<8x96xf32>
    %79 = arith.mulf %76, %78 : vector<8x96xf32>
    %80 = arith.addf %75, %79 : vector<8x96xf32>
    %81 = vector.extract_strided_slice %50 {offsets = [40, 0], sizes = [8, 96], strides = [1, 1]} : vector<64x96xf32> to vector<8x96xf32>
    %82 = vector.extract_strided_slice %53 {offsets = [5, 0], sizes = [1, 96], strides = [1, 1]} : vector<8x96xf32> to vector<1x96xf32>
    %83 = vector.broadcast %82 : vector<1x96xf32> to vector<8x96xf32>
    %84 = arith.mulf %81, %83 : vector<8x96xf32>
    %85 = arith.addf %80, %84 : vector<8x96xf32>
    %86 = vector.extract_strided_slice %50 {offsets = [48, 0], sizes = [8, 96], strides = [1, 1]} : vector<64x96xf32> to vector<8x96xf32>
    %87 = vector.extract_strided_slice %53 {offsets = [6, 0], sizes = [1, 96], strides = [1, 1]} : vector<8x96xf32> to vector<1x96xf32>
    %88 = vector.broadcast %87 : vector<1x96xf32> to vector<8x96xf32>
    %89 = arith.mulf %86, %88 : vector<8x96xf32>
    %90 = arith.addf %85, %89 : vector<8x96xf32>
    %91 = vector.extract_strided_slice %50 {offsets = [56, 0], sizes = [8, 96], strides = [1, 1]} : vector<64x96xf32> to vector<8x96xf32>
    %92 = vector.extract_strided_slice %53 {offsets = [7, 0], sizes = [1, 96], strides = [1, 1]} : vector<8x96xf32> to vector<1x96xf32>
    %93 = vector.broadcast %92 : vector<1x96xf32> to vector<8x96xf32>
    %94 = arith.mulf %91, %93 : vector<8x96xf32>
    %95 = arith.addf %90, %94 : vector<8x96xf32>
    %cst_22 = arith.constant dense<0.000000e+00> : vector<8x96xf32>
    %96 = tpu.matmul %95, %3, %cst_22 {dimension_numbers = #tpu.dot_dimension_numbers<[1], [0], [0], [1], [0, 0, 1, 1], [], []>} : vector<8x96xf32>, vector<96x96xf32>, vector<8x96xf32> -> vector<8x96xf32>
    %97 = vector.shape_cast %5 : vector<1x96xf32> to vector<1x96xf32>
    %98 = vector.broadcast %97 : vector<1x96xf32> to vector<8x96xf32>
    %99 = vector.extract_strided_slice %50 {offsets = [0, 0], sizes = [8, 96], strides = [1, 1]} : vector<64x96xf32> to vector<8x96xf32>
    %100 = vector.extract_strided_slice %96 {offsets = [0, 0], sizes = [1, 96], strides = [1, 1]} : vector<8x96xf32> to vector<1x96xf32>
    %101 = vector.broadcast %100 : vector<1x96xf32> to vector<8x96xf32>
    %102 = arith.mulf %99, %101 : vector<8x96xf32>
    %103 = arith.addf %98, %102 : vector<8x96xf32>
    %104 = vector.extract_strided_slice %50 {offsets = [8, 0], sizes = [8, 96], strides = [1, 1]} : vector<64x96xf32> to vector<8x96xf32>
    %105 = vector.extract_strided_slice %96 {offsets = [1, 0], sizes = [1, 96], strides = [1, 1]} : vector<8x96xf32> to vector<1x96xf32>
    %106 = vector.broadcast %105 : vector<1x96xf32> to vector<8x96xf32>
    %107 = arith.mulf %104, %106 : vector<8x96xf32>
    %108 = arith.addf %103, %107 : vector<8x96xf32>
    %109 = vector.extract_strided_slice %50 {offsets = [16, 0], sizes = [8, 96], strides = [1, 1]} : vector<64x96xf32> to vector<8x96xf32>
    %110 = vector.extract_strided_slice %96 {offsets = [2, 0], sizes = [1, 96], strides = [1, 1]} : vector<8x96xf32> to vector<1x96xf32>
    %111 = vector.broadcast %110 : vector<1x96xf32> to vector<8x96xf32>
    %112 = arith.mulf %109, %111 : vector<8x96xf32>
    %113 = arith.addf %108, %112 : vector<8x96xf32>
    %114 = vector.extract_strided_slice %50 {offsets = [24, 0], sizes = [8, 96], strides = [1, 1]} : vector<64x96xf32> to vector<8x96xf32>
    %115 = vector.extract_strided_slice %96 {offsets = [3, 0], sizes = [1, 96], strides = [1, 1]} : vector<8x96xf32> to vector<1x96xf32>
    %116 = vector.broadcast %115 : vector<1x96xf32> to vector<8x96xf32>
    %117 = arith.mulf %114, %116 : vector<8x96xf32>
    %118 = arith.addf %113, %117 : vector<8x96xf32>
    %119 = vector.extract_strided_slice %50 {offsets = [32, 0], sizes = [8, 96], strides = [1, 1]} : vector<64x96xf32> to vector<8x96xf32>
    %120 = vector.extract_strided_slice %96 {offsets = [4, 0], sizes = [1, 96], strides = [1, 1]} : vector<8x96xf32> to vector<1x96xf32>
    %121 = vector.broadcast %120 : vector<1x96xf32> to vector<8x96xf32>
    %122 = arith.mulf %119, %121 : vector<8x96xf32>
    %123 = arith.addf %118, %122 : vector<8x96xf32>
    %124 = vector.extract_strided_slice %50 {offsets = [40, 0], sizes = [8, 96], strides = [1, 1]} : vector<64x96xf32> to vector<8x96xf32>
    %125 = vector.extract_strided_slice %96 {offsets = [5, 0], sizes = [1, 96], strides = [1, 1]} : vector<8x96xf32> to vector<1x96xf32>
    %126 = vector.broadcast %125 : vector<1x96xf32> to vector<8x96xf32>
    %127 = arith.mulf %124, %126 : vector<8x96xf32>
    %128 = arith.addf %123, %127 : vector<8x96xf32>
    %129 = vector.extract_strided_slice %50 {offsets = [48, 0], sizes = [8, 96], strides = [1, 1]} : vector<64x96xf32> to vector<8x96xf32>
    %130 = vector.extract_strided_slice %96 {offsets = [6, 0], sizes = [1, 96], strides = [1, 1]} : vector<8x96xf32> to vector<1x96xf32>
    %131 = vector.broadcast %130 : vector<1x96xf32> to vector<8x96xf32>
    %132 = arith.mulf %129, %131 : vector<8x96xf32>
    %133 = arith.addf %128, %132 : vector<8x96xf32>
    %134 = vector.extract_strided_slice %50 {offsets = [56, 0], sizes = [8, 96], strides = [1, 1]} : vector<64x96xf32> to vector<8x96xf32>
    %135 = vector.extract_strided_slice %96 {offsets = [7, 0], sizes = [1, 96], strides = [1, 1]} : vector<8x96xf32> to vector<1x96xf32>
    %136 = vector.broadcast %135 : vector<1x96xf32> to vector<8x96xf32>
    %137 = arith.mulf %134, %136 : vector<8x96xf32>
    %138 = arith.addf %133, %137 : vector<8x96xf32>
    %c0_23 = arith.constant 0 : index
    %c0_24 = arith.constant 0 : index
    %c0_25 = arith.constant 0 : index
    %139 = vector.load %arg10[%c0_23, %c0_24, %c0_25] : memref<1x8x96xf32, #tpu.memory_space<vmem>>, vector<1x8x96xf32>
    %140 = vector.shape_cast %139 : vector<1x8x96xf32> to vector<8x96xf32>
    %141 = vector.shape_cast %138 : vector<8x96xf32> to vector<1x8x96xf32>
    tpu.vector_store %arg10[%c0_23, %c0_24, %c0_25], %141 {strides = array<i32>} : memref<1x8x96xf32, #tpu.memory_space<vmem>>, vector<1x8x96xf32>,
    return
  }
  func.func @transform_0(%arg0: i32) -> (i32, i32, i32) {
    %c0_i32 = arith.constant 0 : i32
    %c0_i32_0 = arith.constant 0 : i32
    %c0_i32_1 = arith.constant 0 : i32
    return %arg0, %c0_i32, %c0_i32_0 : i32, i32, i32
  }
  func.func @transform_1(%arg0: i32) -> (i32, i32, i32) {
    %c0_i32 = arith.constant 0 : i32
    %c0_i32_0 = arith.constant 0 : i32
    %c0_i32_1 = arith.constant 0 : i32
    return %arg0, %c0_i32, %c0_i32_0 : i32, i32, i32
  }
  func.func @transform_2(%arg0: i32) -> (i32, i32) {
    %c0_i32 = arith.constant 0 : i32
    %c0_i32_0 = arith.constant 0 : i32
    %c0_i32_1 = arith.constant 0 : i32
    return %c0_i32, %c0_i32_0 : i32, i32
  }
  func.func @transform_3(%arg0: i32) -> (i32, i32) {
    %c0_i32 = arith.constant 0 : i32
    %c0_i32_0 = arith.constant 0 : i32
    %c0_i32_1 = arith.constant 0 : i32
    return %c0_i32, %c0_i32_0 : i32, i32
  }
  func.func @transform_4(%arg0: i32) -> (i32, i32) {
    %c0_i32 = arith.constant 0 : i32
    %c0_i32_0 = arith.constant 0 : i32
    %c0_i32_1 = arith.constant 0 : i32
    return %c0_i32, %c0_i32_0 : i32, i32
  }
  func.func @transform_5(%arg0: i32) -> (i32, i32) {
    %c0_i32 = arith.constant 0 : i32
    %c0_i32_0 = arith.constant 0 : i32
    %c0_i32_1 = arith.constant 0 : i32
    return %c0_i32, %c0_i32_0 : i32, i32
  }
  func.func @transform_6(%arg0: i32) -> (i32, i32) {
    %c0_i32 = arith.constant 0 : i32
    %c0_i32_0 = arith.constant 0 : i32
    %c0_i32_1 = arith.constant 0 : i32
    return %c0_i32, %c0_i32_0 : i32, i32
  }
  func.func @transform_7(%arg0: i32) -> (i32, i32) {
    %c0_i32 = arith.constant 0 : i32
    %c0_i32_0 = arith.constant 0 : i32
    %c0_i32_1 = arith.constant 0 : i32
    return %c0_i32, %c0_i32_0 : i32, i32
  }
  func.func @transform_8(%arg0: i32) -> (i32, i32) {
    %c0_i32 = arith.constant 0 : i32
    %c0_i32_0 = arith.constant 0 : i32
    %c0_i32_1 = arith.constant 0 : i32
    return %c0_i32, %c0_i32_0 : i32, i32
  }
  func.func @transform_9(%arg0: i32) -> (i32, i32, i32) {
    %c0_i32 = arith.constant 0 : i32
    %c0_i32_0 = arith.constant 0 : i32
    %c0_i32_1 = arith.constant 0 : i32
    return %arg0, %c0_i32, %c0_i32_0 : i32, i32, i32
  }
}

</mosaic_0001>

<bundles_post_ra>
// kernel: gcn_forward.1
= control target key start
LH: loop header
LB: loop body
LE: loop exit
PB: predicated region body
PF: predicated region fallthrough
CT: control target
= control target key end

     0   :  { %14 = vsyncpa [#allocation3], 0  ;;  %s3418_s0 = inlined_call_operand.vmem [shape: f32[2,64,54], index: 0, kind: input, shape index: {}]   ;;  %s3419_s1 = inlined_call_operand.vmem [shape: f32[2,8,4], index: 1, kind: input, shape index: {}]   ;;  %s3420_s2 = inlined_call_operand.vmem [shape: f32[64,9], index: 2, kind: input, shape index: {}]   ;;  %s3421_s3 = inlined_call_operand.vmem [shape: f32[54,64], index: 3, kind: input, shape index: {}]   ;;  %s3422_s4 = inlined_call_operand.vmem [shape: f32[576,32], index: 4, kind: input, shape index: {}]   ;;  %s3423_s5 = inlined_call_operand.vmem [shape: f32[4,96], index: 5, kind: input, shape index: {}]   ;;  %s3424_s6 = inlined_call_operand.vmem [shape: f32[1,96], index: 6, kind: input, shape index: {}]   ;;  %s3425_s7 = inlined_call_operand.vmem [shape: f32[96,96], index: 7, kind: input, shape index: {}]   ;;  %s3426_s8 = inlined_call_operand.vmem [shape: f32[1,96], index: 8, kind: input, shape index: {}]   ;;  %s3427_s9 = inlined_call_operand.hbm [shape: f32[2,8,96], index: 9, kind: output, shape index: {}]  }
   0x1   :  { %16 = vsyncpa [#allocation3 + $0x1], 0  ;;  %s2159_s30 = smov 0   ;;  %s2161_s10 = smov 0  }
   0x2   :  { %s2163_s11 = smov 0   ;;  %s2165_s12 = smov 0  }
   0x3 LB: > { %s2180_s13 = sadd.s32 4294967295, %s2097_s12   ;;  %s1800_s14 = sadd.s32 4294967294, %s2097_s12   ;;  %s2097_s12 = sphi %s2165_s12, %s3506_s12   ;;  %s2093_s11 = sphi %s2163_s11, %s3505_s11   ;;  %s2089_s10 = sphi %s2161_s10, %s3504_s10   ;;  %s2085_s30 = sphi %s2159_s30, %s3503_s30  }
   0x4   : > { %s2184_s15 = sadd.s32 1, %s2097_s12   ;;  %s228_s16 = sadd.s32 1, %s2093_s11 }
   0x5   : > { %s225_s17 = ssub.s32 %s2097_s12, %s2184_s15  ;;  %p238_p0 = scmp.ne.s32.totalorder %s2093_s11, %s2089_s10 }
   0x6   : > { %p226_p1 = scmp.eq.s32.totalorder %s225_s17, 0  ;;  %p239_p2 = scmp.eq.s32.totalorder %s2180_s13, 1 }
   0x7   : > { %p244_p3 = scmp.ne.s32.totalorder %s2089_s10, %s2085_s30  ;;  %p245_p4 = scmp.eq.s32.totalorder %s1800_s14, 1 }
   0x8   : > { %s2195_s18 = scalar_select %p226_p1, %s2093_s11, %s228_s16  }
   0x9   : > { %p2197_p5 = por %p239_p2, %p238_p0  ;;  %p2201_p6 = por %p245_p4, %p244_p3 }
   0xa   : > { %p1803_p7 = scmp.ge.s32.totalorder %s2097_s12, 1  ;;  %p299_p8 = scmp.lt.s32.totalorder %s2097_s12, 3 }
   0xc   : > { %p300_p9 = pnand %p1803_p7, %p299_p8 }
   0xe   : > { %303 = sbr.rel (%p300_p9) target bundleno = 877 (0x36d), region = 56 }
  0x13   : > { %v354_v0 = vld [vmem:[%s3421_s3 + $0x30] sm:$0x3f]  ;;  %vm483_vm0 = vcmask 1045504   ;;  %v2213_v1 = vld [vmem:[%s3420_s2 + $0x20] sm:$0xff]  ;;  %v2099_v2 = vmov 0   ;;  %p339_p10 = scmp.lt.s32.totalorder %s2180_s13, 1 }
  0x14   : > { %1907 = vset.pattern.permute.xlu2 %v2099_v2  ;;  %1906 = vset.pattern.permute.xlu1 %v2099_v2  ;;  %v2218_v3 = vld [vmem:[%s3420_s2 + $0x10] sm:$0xff]  ;;  %v2223_v4 = vld [vmem:[%s3420_s2] sm:$0xff]  ;;  %v353_v5 = vld [vmem:[%s3421_s3 + $0x28] sm:$0xff]  ;;  %vm458_vm1 = vcmask 441344   ;;  %v2100_v18 = vmov 1   ;;  %v2101_v24 = vmov 7  }
  0x15   : > { %1905 = vset.pattern.permute.xlu0 %v2099_v2  ;;  %1808 = vmatpush.msk.msra.mxu0 %vm483_vm0, %v354_v0  ;;  %s2233_s16 = scalar_select %p339_p10, %s2180_s13, 1  ;;  %v352_v6 = vld [vmem:[%s3421_s3 + $0x20] sm:$0xff]  ;;  %v351_v7 = vld [vmem:[%s3421_s3 + $0x18] sm:$0xff]  ;;  %v350_v8 = vld [vmem:[%s3421_s3 + $0x10] sm:$0xff]  ;;  %v2102_v26 = vmov 3   ;;  %v2103_v27 = vmov 5  }
  0x16   : > { %1833 = vmatpush.msk.msra.mxu3 %vm483_vm0, %v354_v0  ;;  %585 = vperm.xlu2 %1907, %v2213_v1   ;;  %v2250_v9 = vld [vmem:[%s3420_s2 + $0x28] sm:$0xff]  ;;  %v2255_v10 = vld [vmem:[%s3420_s2 + $0x18] sm:$0xff]  ;;  %v348_v13 = vld [vmem:[%s3421_s3] sm:$0xff]  ;;  %v3433_v28 = vmov 4   ;;  %v3431_v32 = vmov 2   ;;  %v3428_v33 = vmov 6  }
  0x17   : > { %575 = vperm.xlu1 %1906, %v2218_v3   ;;  %565 = vperm.xlu0 %1905, %v2223_v4   ;;  %s1832_s24 = sshll.u32 %s2233_s16, 6  ;;  %v2260_v11 = vld [vmem:[%s3420_s2 + $0x8] sm:$0xff]  ;;  %v2283_v16 = vld [vmem:[%s3420_s2 + $0x38] sm:$0xff]  ;;  %v2288_v17 = vld [vmem:[%s3420_s2 + $0x30] sm:$0xff]  ;;  %v3436_v40 = vmov 8   ;;  %vm536_vm2 = vcmask 1040384  }
  0x18   : > { %497 = vmatpush.msra.mxu0 %v353_v5  ;;  %1834 = vmatpush.msra.mxu3 %v353_v5  ;;  %v349_v12 = vld [vmem:[%s3421_s3 + $0x8] sm:$0xff]  ;;  %s2268_s27 = scalar_lea.vmem %s3418_s0, %s1832_s24  ;;  %s2108_s22 = smov 64   ;;  %vm1075_vm3 = vcmask 1046528   ;;  %vm886_vm4 = vcmask 1041408   ;;  %vm1311_vm5 = vcmask 523264   ;;  %vm1610_vm6 = vcmask 1043456  }
  0x19   : > { %v450_v14 = vld [vmem:[%s2268_s27] sm:$0xff]  ;;  %v451_v19 = vld [vmem:[%s2268_s27 + $0x8] sm:$0xff]  ;;  %v452_v21 = vld [vmem:[%s2268_s27 + $0x10] sm:$0xff]  ;;  %s1807_s17 = sshll.u32 %s2233_s16, 3  ;;  %vm1606_vm7 = vcmask 31744   ;;  %vm1661_vm8 = vcmask 785408  }
  0x1a   : > { %498 = vmatpush.msra.mxu0 %v352_v6  ;;  %1835 = vmatpush.msra.mxu3 %v352_v6  ;;  %v454_v15 = vld [vmem:[%s2268_s27 + $0x20] sm:$0xff]  ;;  %v455_v20 = vld [vmem:[%s2268_s27 + $0x28] sm:$0xff]  ;;  %v456_v22 = vld [vmem:[%s2268_s27 + $0x30] sm:$0xff]  ;;  %s347_s25 = scalar_lea.vmem %s3419_s1, %s1807_s17  ;;  %s336_s29 = sand.u32 1, %s2089_s10  }
  0x1b   : > { %v453_v23 = vld [vmem:[%s2268_s27 + $0x18] sm:$0xff]  ;;  %s1804_s24 = sshll.u32 %s336_s29, 3  ;;  %s1829_s14 = sshll.u32 %s2180_s13, 3 }
  0x1c   : > { %499 = vmatpush.msra.mxu0 %v351_v7  ;;  %1836 = vmatpush.msra.mxu3 %v351_v7  ;;  %v457_v25 = vld [vmem:[%s2268_s27 + $0x38] sm:$0xff]  ;;  %s1724_s21 = scalar_lea.hbm %s3427_s9, %s1829_s14  ;;  %s338_s23 = scalar_lea.vmem [#allocation2], %s1804_s24 }
  0x1d   : > { %s1728_s16 = sshll.u32 %s1724_s21, 4  ;;  %s1714_s13 = scalar_lea.sflag [#allocation3], %s336_s29  ;;  %s1729_s16 = int_to_ptr.hbm [resolvable:$true] %s1728_s16 }
  0x1e   : > { %500 = vmatpush.msra.mxu0 %v350_v8  ;;  %1837 = vmatpush.msra.mxu3 %v350_v8  ;;  %s2049_s26 = sshra.s32 %s1729_s16, 4  ;;  %s2055_s24 = scalar_lea.hbm %s3427_s9, 16  ;;  %s2050_s26 = int_to_ptr.hbm [resolvable:$true] %s2049_s26 }
  0x1f   : > { %590 = vperm.xlu2 %1907, %v2250_v9   ;;  %580 = vperm.xlu1 %1906, %v2255_v10   ;;  %s2051_s27 = scalar_lea.hbm %s2050_s26, 8  ;;  %p2056_p0 = scmp.lt.s32.totalorder %s2050_s26, %s3427_s9 }
  0x20   : > { %570 = vperm.xlu0 %1905, %v2260_v11   ;;  %501 = vmatpush.msra.mxu0 %v349_v12  ;;  %p2052_p11 = scmp.ne.s32.totalorder %s2050_s26, %s2051_s27  ;;  %p2057_p1 = scmp.lt.s32.totalorder %s2055_s24, %s2051_s27 }
  0x21   : > { %1838 = vmatpush.msra.mxu3 %v349_v12 }
  0x22   : > { %502 = vmatpush.msra.mxu0 %v348_v13  ;;  %p2053_p12 = pnand %p2052_p11, %p2197_p5  ;;  %p2058_p2 = por %p2057_p1, %p2056_p0 }
  0x23   : > { %1839 = vmatpush.msra.mxu3 %v348_v13  ;;  %1809 = vmatmul.msk.f32.vlgmr.msra.gmra.mxu0 %vm458_vm1, %v450_v14 }
  0x24   : > { %1813 = vmatmul.msk.f32.vlgmr.msra.gmra.mxu3 %vm458_vm1, %v454_v15  ;;  %p2054_p13 = pneg %p2053_p12 }
  0x26   : > { %p2059_p3 = pnand %p2058_p2, %p2054_p13 }
  0x27   : > { %1908 = vset.pattern.permute.xlu2 %v2100_v18  ;;  %600 = vperm.xlu1 %1906, %v2283_v16  }
  0x28   : > { %595 = vperm.xlu0 %1905, %v2288_v17   ;;  %628 = vperm.xlu2 %1908, %v2213_v1  }
  0x2b   : > { %1810 = vmatmul.msk.f32.gmra.mxu0 %vm458_vm1, %v451_v19 }
  0x2c   : > { %1814 = vmatmul.msk.f32.gmra.mxu3 %vm458_vm1, %v455_v20 }
  0x2f   : > { %1910 = vset.pattern.permute.xlu1 %v2100_v18 }
  0x30   : > { %1909 = vset.pattern.permute.xlu0 %v2100_v18  ;;  %636 = vperm.xlu2 %1908, %v2288_v17  }
  0x31   : > { %612 = vperm.xlu1 %1910, %v2223_v4   ;;  %632 = vperm.xlu0 %1909, %v2250_v9  }
  0x33   : > { %1811 = vmatmul.msk.f32.gmra.mxu0 %vm458_vm1, %v452_v21 }
  0x34   : > { %1815 = vmatmul.msk.f32.gmra.mxu3 %vm458_vm1, %v456_v22 }
  0x38   : > { %640 = vperm.xlu2 %1908, %v2283_v16  }
  0x39   : > { %616 = vperm.xlu1 %1910, %v2260_v11   ;;  %1915 = vset.pattern.permute.xlu0 %v2101_v24 }
  0x3a   : > { %921 = vperm.xlu0 %1915, %v2223_v4  }
  0x3b   : > { %1812 = vmatmul.msk.f32.gmra.mxu0 %vm458_vm1, %v453_v23 }
  0x3c   : > { %1816 = vmatmul.msk.f32.gmra.mxu3 %vm458_vm1, %v457_v25 }
  0x40   : > { %620 = vperm.xlu2 %1908, %v2218_v3  }
  0x41   : > { %1911 = vset.pattern.permute.xlu1 %v2102_v26 }
  0x42   : > { %695 = vperm.xlu1 %1911, %v2260_v11   ;;  %927 = vperm.xlu0 %1915, %v2218_v3  }
  0x48   : > { %1913 = vset.pattern.permute.xlu2 %v2103_v27 }
  0x49   : > { %809 = vperm.xlu2 %1913, %v2260_v11  }
  0x4a   : > { %1912 = vset.pattern.permute.xlu1 %v2103_v27  ;;  %930 = vperm.xlu0 %1915, %v2255_v10  }
  0x4b   : > { %806 = vperm.xlu1 %1912, %v2223_v4  }
  0x51   : > { %812 = vperm.xlu2 %1913, %v2218_v3  }
  0x52   : > { %1922 = vset.pattern.permute.xlu0 %v3433_v28 }
  0x53   : > { %1914 = vset.pattern.permute.xlu1 %v2100_v18  ;;  %752 = vperm.xlu0 %1922, %v2260_v11  }
  0x54   : > { %624 = vperm.xlu1 %1914, %v2255_v10  }
  0x59   : > { %815 = vperm.xlu2 %1913, %v2255_v10  }
  0x5b   : > { %1923 = vset.pattern.permute.xlu0 %v2102_v26 }
  0x5c   : > { %1916 = vset.pattern.permute.xlu1 %v2101_v24  ;;  %692 = vperm.xlu0 %1923, %v2223_v4  }
  0x5d   : > { %924 = vperm.xlu1 %1916, %v2260_v11  }
  0x61   : > { %818 = vperm.xlu2 %1913, %v2213_v1  }
  0x64   : > { %698 = vperm.xlu0 %1923, %v2218_v3  }
  0x65   : > { %1917 = vset.pattern.permute.xlu1 %v2102_v26 }
  0x66   : > { %701 = vperm.xlu1 %1917, %v2255_v10  }
  0x69   : > { %1918 = vset.pattern.permute.xlu2 %v2102_v26 }
  0x6a   : > { %707 = vperm.xlu2 %1918, %v2250_v9  }
  0x6c   : > { %713 = vperm.xlu0 %1923, %v2283_v16  }
  0x6e   : > { %704 = vperm.xlu1 %1917, %v2213_v1  }
  0x70   : > { %v2332_v29 = vpop.permute.xlu2 %585 }
  0x72   : > { %1921 = vset.pattern.permute.xlu2 %v3433_v28 }
  0x73   : > { %749 = vperm.xlu2 %1921, %v2223_v4  }
  0x74   : > { %1927 = vset.pattern.permute.xlu0 %v2103_v27 }
  0x75   : > { %821 = vperm.xlu0 %1927, %v2250_v9  }
  0x76   : > { %1919 = vset.pattern.permute.xlu1 %v2101_v24 }
  0x77   : > { %933 = vperm.xlu1 %1919, %v2213_v1  }
  0x79   : > { %v2339_v30 = vpop.permute.xlu2 %590 }
  0x7b   : > { %1925 = vset.pattern.permute.xlu2 %v2101_v24 }
  0x7c   : > { %936 = vperm.xlu2 %1925, %v2250_v9  }
  0x7d   : > { %827 = vperm.xlu0 %1927, %v2283_v16  }
  0x7f   : > { %1920 = vset.pattern.permute.xlu1 %v2102_v26 }
  0x80   : > { %710 = vperm.xlu1 %1920, %v2288_v17  }
  0x82   : > { %v2345_v31 = vpop.permute.xlu2 %628 }
  0x84   : > { %1926 = vset.pattern.permute.xlu2 %v3431_v32 }
  0x85   : > { %652 = vperm.xlu2 %1926, %v2223_v4   ;;  %1988 = vset.pattern.permute.xlu0 %v3428_v33 }
  0x88   : > { %1924 = vset.pattern.permute.xlu1 %v2103_v27 }
  0x89   : > { %824 = vperm.xlu1 %1924, %v2288_v17   ;;  %v2351_v34 = vpop.permute.xlu0 %565  ;;  %v2353_v35 = vpop.permute.xlu1 %575 }
  0x8a   : > { %v2355_v36 = vpop.permute.xlu2 %636 }
  0x8d   : > { %1929 = vset.pattern.permute.xlu2 %v3428_v33 }
  0x8e   : > { %863 = vperm.xlu2 %1929, %v2223_v4  }
  0x91   : > { %1928 = vset.pattern.permute.xlu1 %v3433_v28  ;;  %v2360_v37 = vpop.permute.xlu1 %580 }
  0x92   : > { %755 = vperm.xlu1 %1928, %v2218_v3   ;;  %v2363_v38 = vpop.permute.xlu0 %570  ;;  %v2365_v39 = vpop.permute.xlu2 %640 }
  0x96   : > { %1932 = vset.pattern.permute.xlu2 %v3436_v40 }
  0x97   : > { %978 = vperm.xlu2 %1932, %v2223_v4  }
  0x99   : > { %v2369_v41 = vpop.permute.xlu1 %600 }
  0x9a   : > { %1930 = vset.pattern.permute.xlu1 %v3428_v33  ;;  %v2372_v42 = vpop.permute.xlu0 %595  ;;  %v2374_v43 = vpop.permute.xlu2 %620 }
  0x9b   : > { %866 = vperm.xlu1 %1930, %v2260_v11  }
  0x9f   : > { %1934 = vset.pattern.permute.xlu2 %v3431_v32 }
  0xa0   : > { %656 = vperm.xlu2 %1934, %v2260_v11   ;;  %v2379_v44 = vpop.f32.mrf.mxu0 }
  0xa1   : > { %v537_v12 = vrot.slane %v2379_v44, 7 }
  0xa3   : > { %1931 = vset.pattern.permute.xlu1 %v2101_v24  ;;  %v633_v45 = vpop.permute.xlu0 %632  ;;  %v2382_v46 = vpop.permute.xlu2 %809 }
  0xa4   : > { %939 = vperm.xlu1 %1931, %v2288_v17   ;;  %v2385_v47 = vpop.permute.xlu1 %612  ;;  %v830_v5 = vrot.slane %v2382_v46, 7  ;;  %v370_v46 = vld [vmem:[%s3422_s4 + $0x78] sm:$0xff] }
  0xa5   : > { %1840 = vmatpush.msra.mxu2 %v370_v46  ;;  %1360 = vmatpush.msra.mxu1 %v370_v46 }
  0xa7   : > { %v2387_v48 = vpop.f32.mrf.mxu3 }
  0xa8   : > { %3461 = vst [vmem:[#allocation5_spill] sm:$0xff] %v2387_v48  ;;  %v2389_v49 = vpop.f32.mrf.mxu0  ;;  %1936 = vset.pattern.permute.xlu2 %v3428_v33  ;;  %v544_v58 = vrot.slane %v2387_v48, 7 }
  0xa9   : > { %869 = vperm.xlu2 %1936, %v2218_v3   ;;  %v538_v0 = vrot.slane %v2389_v49, 7 }
  0xab   : > { %v2393_v50 = vpop.permute.xlu2 %812  ;;  %v2442_v18 = vsel %vm536_vm2, %v537_v12, %v538_v0 }
  0xac   : > { %1933 = vset.pattern.permute.xlu1 %v3436_v40  ;;  %v2396_v51 = vpop.permute.xlu0 %921  ;;  %v617_v52 = vpop.permute.xlu1 %616 }
  0xad   : > { %981 = vperm.xlu1 %1933, %v2260_v11  }
  0xaf   : > { %v2399_v53 = vpop.f32.mrf.mxu3 }
  0xb0   : > { %3462 = vst [vmem:[#allocation6_spill] sm:$0xff] %v2399_v53  ;;  %v2401_v54 = vpop.f32.mrf.mxu0  ;;  %v546_v59 = vrot.slane %v2399_v53, 7 }
  0xb1   : > { %3463 = vst [vmem:[#allocation7_spill] sm:$0xff] %v2401_v54  ;;  %1953 = vset.pattern.permute.xlu2 %v3436_v40  ;;  %v540_v6 = vrot.slane %v2401_v54, 7 }
  0xb2   : > { %984 = vperm.xlu2 %1953, %v2218_v3   ;;  %v2422_v62 = vsel %vm536_vm2, %v544_v58, %v546_v59 }
  0xb3   : > { %v2405_v55 = vpop.permute.xlu2 %815  ;;  %v648_v11 = vmul.f32 %v633_v45, %v2422_v62  ;;  %v2445_v19 = vsel %vm536_vm2, %v538_v0, %v540_v6 }
  0xb4   : > { %v2407_v56 = vpop.permute.xlu0 %927  ;;  %v2409_v57 = vpop.permute.xlu1 %695 }
  0xb5   : > { %1935 = vset.pattern.permute.xlu1 %v3433_v28  ;;  %v944_v28 = vrot.slane %v2396_v51, 6  ;;  %v3477_v48 = vrot.slane %v2407_v56, 6 }
  0xb6   : > { %758 = vperm.xlu1 %1935, %v2255_v10  }
  0xb7   : > { %v2415_v60 = vpop.f32.mrf.mxu3 }
  0xb8   : > { %3464 = vst [vmem:[#allocation8_spill] sm:$0xff] %v2415_v60  ;;  %v2417_v61 = vpop.f32.mrf.mxu0 }
  0xb9   : > { %3465 = vst [vmem:[#allocation9_spill] sm:$0xff] %v2417_v61  ;;  %v542_v63 = vrot.slane %v2417_v61, 7 }
  0xba   : > { %1975 = vset.pattern.permute.xlu2 %v3428_v33  ;;  %v2483_v33 = vsel %vm536_vm2, 0.0, %v537_v12 }
  0xbb   : > { %v2428_v2 = vsel %vm536_vm2, %v542_v63, %v544_v58  ;;  %v2430_v4 = vpop.permute.xlu2 %818  ;;  %v2464_v45 = vsel %vm536_vm2, %v540_v6, %v542_v63  ;;  %v716_v6 = vrot.slane %v2409_v57, 7 }
  0xbc   : > { %v2434_v7 = vpop.permute.xlu0 %930  ;;  %v647_v8 = vmul.f32 %v2345_v31, %v2428_v2 }
  0xbd   : > { %v807_v13 = vpop.permute.xlu1 %806 }
  0xbe   : > { %v829_v14 = vrot.slane %v807_v13, 7  ;;  %v1955_v15 = vpack.i.bf16 %v648_v11, %v647_v8  ;;  %1952 = vset.pattern.permute.xlu1 %v2101_v24  ;;  %v548_v8 = vrot.slane %v2415_v60, 7 }
  0xbf   : > { %v2455_v24 = vpop.f32.mrf.mxu3 }
  0xc0   : > { %v831_v20 = vsel %vm536_vm2, %v829_v14, %v830_v5  ;;  %v853_v21 = vmul.f32 %v829_v14, %v2442_v18  ;;  %1956 = vrot.lane.b32.xlu2 %v1955_v15, %s2108_s22  ;;  %v3430_v27 = vrot.slane %v2455_v24, 7 }
  0xc1   : > { %v2453_v22 = vmul.f32 %v831_v20, %v2445_v19  ;;  %v644_v20 = vmul.f32 %v617_v52, %v2442_v18 }
  0xc2   : > { %v1160_v23 = vrot.slane %v853_v21, 1  ;;  %v2474_v13 = vsel %vm536_vm2, %v548_v8, %v3430_v27 }
  0xc3   : > { %v3435_v25 = vrot.slane %v2453_v22, 1  ;;  %v650_v63 = vmul.f32 %v2365_v39, %v2474_v13  ;;  %v3467_v46 = vrot.slane %v2453_v22, 1 }
  0xc4   : > { %v2458_v26 = vpop.permute.xlu2 %707 }
  0xc5   : > { %v2461_v31 = vpop.permute.xlu0 %752  ;;  %v1162_v0 = vsel %vm1075_vm3, %v1160_v23, %v3435_v25  ;;  %v1970_v57 = vpack.i.bf16 %v650_v63, %v644_v20 }
  0xc6   : > { %v625_v58 = vpop.permute.xlu1 %624  ;;  %v3438_v21 = vrot.slane %v2461_v31, 7 }
  0xc7   : > { %v646_v11 = vmul.f32 %v625_v58, %v2464_v45 }
  0xc9   : > { %v1960_v14 = vpack.i.bf16 %v646_v11, %v1162_v0 }
  0xcb   : > { %1961 = vrot.lane.b32.xlu2 %v1960_v14, %s2108_s22 }
  0xcd   : > { %v750_v15 = vpop.permute.xlu2 %749 }
  0xce   : > { %v772_v23 = vrot.slane %v750_v15, 7  ;;  %v693_v58 = vpop.permute.xlu0 %692 }
  0xcf   : > { %v715_v27 = vrot.slane %v693_v58, 7  ;;  %v2485_v32 = vpop.permute.xlu1 %924 }
  0xd0   : > { %v774_v0 = vsel %vm536_vm2, %v772_v23, %v3438_v21  ;;  %v796_v39 = vmul.f32 %v772_v23, %v2483_v33  ;;  %v3439_v15 = vrot.slane %v2485_v32, 6  ;;  %v832_v21 = vrot.slane %v2393_v50, 7 }
  0xd1   : > { %v2492_v11 = vmul.f32 %v774_v0, %v2442_v18  ;;  %v717_v52 = vsel %vm536_vm2, %v715_v27, %v716_v6  ;;  %v739_v14 = vmul.f32 0.0, %v715_v27  ;;  %v645_v27 = vmul.f32 %v2374_v43, %v2445_v19 }
  0xd2   : > { %v1126_v12 = vrot.slane %v796_v39, 1  ;;  %v740_v58 = vmul.f32 %v717_v52, %v2483_v33  ;;  %v946_v20 = vsel %vm886_vm4, %v944_v28, %v3439_v15 }
  0xd3   : > { %v3440_v25 = vrot.slane %v2492_v11, 1  ;;  %v1076_v40 = vrot.slane %v739_v14, 1  ;;  %1971 = vrot.lane.b32.xlu2 %v1970_v57, %s2108_s22  ;;  %v2512_v57 = vmul.f32 %v946_v20, %v2442_v18 }
  0xd4   : > { %v1077_v63 = vrot.slane %v740_v58, 1 }
  0xd5   : > { %v2508_v23 = vsel %vm1075_vm3, %v1126_v12, %v3440_v25  ;;  %v968_v12 = vmul.f32 %v944_v28, %v2483_v33  ;;  %v3444_v28 = vrot.slane %v2512_v57, 2  ;;  %v402_v25 = vld [vmem:[%s3422_s4 + $0x178] sm:$0xff] }
  0xd6   : > { %v699_v51 = vpop.permute.xlu0 %698  ;;  %v1078_v0 = vsel %vm1075_vm3, %v1076_v40, %v1077_v63  ;;  %v2514_v14 = vpop.permute.xlu2 %936  ;;  %v2526_v40 = vsel %vm536_vm2, %v546_v59, %v548_v8  ;;  %v833_v59 = vsel %vm536_vm2, %v830_v5, %v832_v21  ;;  %1442 = vmatpush.msrb.mxu3 %v402_v25 }
  0xd7   : > { %v718_v39 = vrot.slane %v699_v51, 7  ;;  %v1937_v52 = vpack.i.bf16 %v1078_v0, %v645_v27  ;;  %v643_v27 = vmul.f32 %v2385_v47, %v2483_v33  ;;  %v1244_v8 = vrot.slane %v968_v12, 2  ;;  %v369_v12 = vld [vmem:[%s3422_s4 + $0x70] sm:$0xff] }
  0xd8   : > { %v2516_v58 = vpop.permute.xlu1 %701  ;;  %1841 = vmatpush.msra.mxu2 %v369_v12  ;;  %1361 = vmatpush.msra.mxu1 %v369_v12 }
  0xd9   : > { %v719_v43 = vsel %vm536_vm2, %v716_v6, %v718_v39  ;;  %v720_v15 = vrot.slane %v2516_v58, 7  ;;  %1938 = vrot.lane.b32.xlu1 %v1937_v52, %s2108_s22  ;;  %v649_v6 = vmul.f32 %v2355_v36, %v2526_v40  ;;  %v397_v58 = vld [vmem:[%s3422_s4 + $0x150] sm:$0xff] }
  0xda   : > { %v741_v20 = vmul.f32 %v719_v43, %v2442_v18  ;;  %v1246_v43 = vsel %vm483_vm0, %v1244_v8, %v3444_v28 }
  0xdb   : > { %v721_v50 = vsel %vm536_vm2, %v718_v39, %v720_v15  ;;  %872 = vperm.xlu2 %1975, %v2255_v10   ;;  %v1947_v52 = vpack.i.bf16 %v649_v6, %v643_v27  ;;  %v3466_v27 = vmov 8  }
  0xdc   : > { %v2539_v51 = vmul.f32 %v721_v50, %v2445_v19  ;;  %v1079_v47 = vrot.slane %v741_v20, 1  ;;  %v2554_v50 = vmul.f32 %v833_v59, %v2464_v45  ;;  %v368_v59 = vld [vmem:[%s3422_s4 + $0x68] sm:$0xff] }
  0xdd   : > { %1842 = vmatpush.msra.mxu2 %v368_v59  ;;  %1362 = vmatpush.msra.mxu1 %v368_v59 }
  0xde   : > { %v3442_v0 = vrot.slane %v2539_v51, 1  ;;  %v3443_v6 = vrot.slane %v2554_v50, 1  ;;  %v1080_v8 = vsel %vm1075_vm3, %v1077_v63, %v1079_v47  ;;  %v366_v63 = vld [vmem:[%s3422_s4 + $0x58] sm:$0xff] }
  0xdf   : > { %v2563_v20 = vpop.permute.xlu2 %652 }
  0xe0   : > { %v2545_v39 = vpop.permute.xlu1 %704  ;;  %v1082_v36 = vsel %vm1075_vm3, %v1079_v47, %v3442_v0 }
  0xe1   : > { %1948 = vrot.lane.b32.xlu1 %v1947_v52, %s2108_s22  ;;  %v1942_v5 = vpack.i.bf16 %v1082_v36, %v1246_v43  ;;  %v367_v52 = vld [vmem:[%s3422_s4 + $0x60] sm:$0xff]  ;;  %v3441_v36 = vrot.slane %v2407_v56, 6  ;;  %v834_v43 = vrot.slane %v2405_v55, 7  ;;  %v3468_v55 = vrot.slane %v2485_v32, 6  ;;  %v364_v32 = vld [vmem:[%s3422_s4 + $0x48] sm:$0xff] }
  0xe2   : > { %1843 = vmatpush.msra.mxu2 %v367_v52  ;;  %1363 = vmatpush.msra.mxu1 %v367_v52  ;;  %v722_v25 = vrot.slane %v2545_v39, 7  ;;  %v362_v39 = vld [vmem:[%s3422_s4 + $0x38] sm:$0xff] }
  0xe3   : > { %1943 = vrot.lane.b32.xlu0 %v1942_v5, %s2108_s22  ;;  %1981 = vset.pattern.permute.xlu2 %v3466_v27  ;;  %v1164_v5 = vsel %vm1075_vm3, %v3467_v46, %v3443_v6  ;;  %v948_v59 = vsel %vm886_vm4, %v3468_v55, %v3441_v36  ;;  %v365_v46 = vld [vmem:[%s3422_s4 + $0x50] sm:$0xff]  ;;  %v835_v52 = vsel %vm536_vm2, %v832_v21, %v834_v43  ;;  %v400_v21 = vld [vmem:[%s3422_s4 + $0x168] sm:$0xff] }
  0xe4   : > { %987 = vperm.xlu2 %1981, %v2255_v10   ;;  %v1965_v12 = vpack.i.bf16 %v1164_v5, %v1080_v8  ;;  %1844 = vmatpush.msra.mxu2 %v366_v63  ;;  %v401_v8 = vld [vmem:[%s3422_s4 + $0x170] sm:$0xff]  ;;  %v3469_v5 = vmov 4   ;;  %v2612_v55 = vmul.f32 %v948_v59, %v2445_v19  ;;  %v2623_v36 = vmul.f32 %v835_v52, %v2428_v2 }
  0xe5   : > { %1443 = vmatpush.msrb.mxu3 %v401_v8  ;;  %1364 = vmatpush.msra.mxu1 %v366_v63  ;;  %v3447_v59 = vrot.slane %v2430_v4, 7  ;;  %v399_v8 = vld [vmem:[%s3422_s4 + $0x160] sm:$0xff]  ;;  %v723_v63 = vsel %vm536_vm2, %v720_v15, %v722_v25  ;;  %v360_v15 = vld [vmem:[%s3422_s4 + $0x28] sm:$0xff] }
  0xe6   : > { %1845 = vmatpush.msra.mxu2 %v365_v46  ;;  %v2660_v0 = vmul.f32 %v723_v63, %v2464_v45 }
  0xe7   : > { %1444 = vmatpush.msrb.mxu3 %v400_v21  ;;  %1365 = vmatpush.msra.mxu1 %v365_v46  ;;  %v361_v21 = vld [vmem:[%s3422_s4 + $0x30] sm:$0xff]  ;;  %v398_v46 = vld [vmem:[%s3422_s4 + $0x158] sm:$0xff]  ;;  %v837_v6 = vsel %vm536_vm2, %v834_v43, %v3447_v59  ;;  %v359_v43 = vld [vmem:[%s3422_s4 + $0x20] sm:$0xff] }
  0xe8   : > { %v2594_v22 = vpop.permute.xlu2 %863  ;;  %1846 = vmatpush.msra.mxu2 %v364_v32  ;;  %v2677_v63 = vmul.f32 %v837_v6, %v2422_v62  ;;  %v395_v59 = vld [vmem:[%s3422_s4 + $0x140] sm:$0xff]  ;;  %v1083_v53 = vrot.slane %v2660_v0, 1  ;;  %v2690_v6 = vpop.permute.xlu0 %713  ;;  %v394_v0 = vld [vmem:[%s3422_s4 + $0x138] sm:$0xff] }
  0xe9   : > { %v2586_v47 = vpop.permute.xlu1 %933  ;;  %942 = vperm.xlu1 %1952, %v2283_v16   ;;  %1445 = vmatpush.msrb.mxu3 %v399_v8  ;;  %v1165_v8 = vrot.slane %v2623_v36, 1  ;;  %v3470_v36 = vrot.slane %v2612_v55, 2 }
  0xea   : > { %1366 = vmatpush.msra.mxu1 %v364_v32  ;;  %v396_v32 = vld [vmem:[%s3422_s4 + $0x148] sm:$0xff] }
  0xeb   : > { %1966 = vrot.lane.b32.xlu0 %v1965_v12, %s2108_s22  ;;  %v363_v12 = vld [vmem:[%s3422_s4 + $0x40] sm:$0xff]  ;;  %1446 = vmatpush.msrb.mxu3 %v398_v46  ;;  %v3471_v46 = vrot.slane %v2512_v57, 2  ;;  %v3472_v57 = vrot.slane %v2554_v50, 1 }
  0xec   : > { %1987 = vset.pattern.permute.xlu2 %v3469_v5  ;;  %1847 = vmatpush.msra.mxu2 %v363_v12  ;;  %v355_v50 = vld [vmem:[%s3422_s4] sm:$0xff] }
  0xed   : > { %764 = vperm.xlu2 %1987, %v2250_v9   ;;  %v1248_v60 = vsel %vm483_vm0, %v3471_v46, %v3470_v36  ;;  %1447 = vmatpush.msrb.mxu3 %v397_v58  ;;  %v1166_v58 = vsel %vm1075_vm3, %v3472_v57, %v1165_v8  ;;  %v358_v46 = vld [vmem:[%s3422_s4 + $0x18] sm:$0xff]  ;;  %v3474_v57 = vmov 2  }
  0xee   : > { %1848 = vmatpush.msra.mxu2 %v362_v39  ;;  %1367 = vmatpush.msra.mxu1 %v363_v12  ;;  %v1976_v36 = vpack.i.bf16 %v1248_v60, %v1166_v58  ;;  %v3473_v12 = vrot.slane %v2458_v26, 7  ;;  %v393_v58 = vld [vmem:[%s3422_s4 + $0x130] sm:$0xff] }
  0xef   : > { %1448 = vmatpush.msrb.mxu3 %v396_v32  ;;  %v357_v32 = vld [vmem:[%s3422_s4 + $0x10] sm:$0xff] }
  0xf0   : > { %1849 = vmatpush.msra.mxu2 %v361_v21  ;;  %1368 = vmatpush.msra.mxu1 %v362_v39  ;;  %v725_v60 = vsel %vm536_vm2, %v722_v25, %v3473_v12  ;;  %v356_v25 = vld [vmem:[%s3422_s4 + $0x8] sm:$0xff]  ;;  %v3475_v12 = vrot.slane %v2539_v51, 1 }
  0xf1   : > { %1954 = vset.pattern.permute.xlu1 %v3469_v5  ;;  %v2657_v28 = vpop.permute.xlu2 %978  ;;  %1449 = vmatpush.msrb.mxu3 %v395_v59  ;;  %v392_v51 = vld [vmem:[%s3422_s4 + $0x128] sm:$0xff] }
  0xf2   : > { %v2637_v52 = vpop.permute.xlu1 %710  ;;  %761 = vperm.xlu1 %1954, %v2213_v1   ;;  %1850 = vmatpush.msra.mxu2 %v360_v15  ;;  %v1084_v59 = vsel %vm1075_vm3, %v3475_v12, %v1083_v53 }
  0xf3   : > { %875 = vperm.xlu0 %1988, %v2213_v1   ;;  %1450 = vmatpush.msrb.mxu3 %v394_v0  ;;  %v3476_v0 = vrot.slane %v2434_v7, 6 }
  0xf4   : > { %1851 = vmatpush.msra.mxu2 %v359_v43  ;;  %1369 = vmatpush.msra.mxu1 %v361_v21 }
  0xf5   : > { %1994 = vset.pattern.permute.xlu2 %v3466_v27  ;;  %v950_v61 = vsel %vm886_vm4, %v3477_v48, %v3476_v0  ;;  %1451 = vmatpush.msrb.mxu3 %v393_v58  ;;  %v391_v48 = vld [vmem:[%s3422_s4 + $0x120] sm:$0xff] }
  0xf6   : > { %990 = vperm.xlu2 %1994, %v2213_v1   ;;  %1852 = vmatpush.msra.mxu2 %v358_v46  ;;  %v2741_v56 = vmul.f32 %v950_v61, %v2464_v45  ;;  %v389_v61 = vld [vmem:[%s3422_s4 + $0x110] sm:$0xff] }
  0xf7   : > { %1370 = vmatpush.msra.mxu1 %v360_v15  ;;  %1452 = vmatpush.msrb.mxu3 %v392_v51  ;;  %v726_v51 = vrot.slane %v2637_v52, 7  ;;  %v728_v52 = vrot.slane %v2690_v6, 7  ;;  %v3479_v15 = vrot.slane %v2461_v31, 7  ;;  %v387_v31 = vld [vmem:[%s3422_s4 + $0x100] sm:$0xff] }
  0xf8   : > { %1853 = vmatpush.msra.mxu2 %v357_v32 }
  0xf9   : > { %1371 = vmatpush.msra.mxu1 %v359_v43  ;;  %1453 = vmatpush.msrb.mxu3 %v391_v48 }
  0xfa   : > { %1977 = vrot.lane.b32.xlu1 %v1976_v36, %s2108_s22  ;;  %v2714_v36 = vmul.f32 %v725_v60, %v2428_v2  ;;  %v2727_v54 = vpop.permute.xlu2 %656  ;;  %1854 = vmatpush.msra.mxu2 %v356_v25  ;;  %v3478_v60 = vrot.slane %v2677_v63, 1 }
  0xfb   : > { %v2703_v39 = vpop.permute.xlu1 %824  ;;  %878 = vperm.xlu0 %1988, %v2250_v9   ;;  %1995 = vset.pattern.permute.xlu1 %v3474_v57 }
  0xfc   : > { %v1168_v21 = vsel %vm1075_vm3, %v1165_v8, %v3478_v60  ;;  %1855 = vmatpush.msra.mxu2 %v355_v50  ;;  %v3451_v0 = vrot.slane %v2714_v36, 1  ;;  %v390_v8 = vld [vmem:[%s3422_s4 + $0x118] sm:$0xff]  ;;  %1372 = vmatpush.msra.mxu1 %v358_v46  ;;  %v388_v46 = vld [vmem:[%s3422_s4 + $0x108] sm:$0xff] }
  0xfd   : > { %v1982_v12 = vpack.i.bf16 %v1168_v21, %v1084_v59  ;;  %v822_v59 = vpop.permute.xlu0 %821  ;;  %1454 = vmatpush.msrb.mxu3 %v390_v8  ;;  %v953_v21 = vrot.slane %v2514_v14, 6  ;;  %v3481_v8 = vrot.slane %v2612_v55, 2  ;;  %v729_v55 = vsel %vm536_vm2, %v726_v51, %v728_v52 }
  0xfe   : > { %1996 = vset.pattern.permute.xlu2 %v3469_v5  ;;  %v1086_v43 = vsel %vm1075_vm3, %v1083_v53, %v3451_v0  ;;  %1373 = vmatpush.msra.mxu1 %v357_v32  ;;  %v838_v48 = vrot.slane %v822_v59, 7 }
  0xff   : > { %767 = vperm.xlu2 %1996, %v2288_v17   ;;  %1455 = vmatpush.msrb.mxu3 %v389_v61  ;;  %v3483_v61 = vrot.slane %v2434_v7, 6 }
 0x100   : > { %1374 = vmatpush.msra.mxu1 %v356_v25  ;;  %v3484_v25 = vrot.slane %v2430_v4, 7  ;;  %v3485_v4 = vrot.slane %v2492_v11, 1 }
 0x101   : > { %1456 = vmatpush.msrb.mxu3 %v388_v46  ;;  %v2807_v46 = vmul.f32 %v729_v55, %v2526_v40 }
 0x102   : > { %1983 = vrot.lane.b32.xlu1 %v1982_v12, %s2108_s22  ;;  %1375 = vmatpush.msra.mxu1 %v355_v50 }
 0x103   : > { %1997 = vset.pattern.permute.xlu0 %v3474_v57  ;;  %v2763_v12 = vpop.permute.xlu2 %869  ;;  %1457 = vmatpush.msrb.mxu3 %v387_v31 }
 0x104   : > { %v2749_v58 = vpop.permute.xlu1 %755  ;;  %660 = vperm.xlu0 %1997, %v2218_v3   ;;  %v951_v3 = vrot.slane %v2586_v47, 6  ;;  %v3480_v47 = vrot.slane %v2741_v56, 2 }
 0x105   : > { %v3452_v60 = vrot.slane %v2749_v58, 7 }
 0x106   : > { %v1250_v0 = vsel %vm483_vm0, %v3481_v8, %v3480_v47  ;;  %v3453_v47 = vrot.slane %v2763_v12, 6 }
 0x107   : > { %v776_v53 = vsel %vm536_vm2, %v3479_v15, %v3452_v60  ;;  %2003 = vset.pattern.permute.xlu2 %v3466_v27  ;;  %v1989_v59 = vpack.i.bf16 %v1086_v43, %v1250_v0  ;;  %v3482_v15 = vrot.slane %v2458_v26, 7  ;;  %v839_v26 = vsel %vm536_vm2, %v3484_v25, %v838_v48 }
 0x108   : > { %v2781_v32 = vmul.f32 %v776_v53, %v2445_v19  ;;  %993 = vperm.xlu2 %2003, %v2250_v9   ;;  %v952_v53 = vsel %vm886_vm4, %v3483_v61, %v951_v3  ;;  %v954_v43 = vsel %vm886_vm4, %v951_v3, %v953_v21 }
 0x109   : > { %v727_v60 = vsel %vm536_vm2, %v3482_v15, %v726_v51  ;;  %v3457_v51 = vrot.slane %v2594_v22, 6  ;;  %v972_v3 = vmul.f32 %v952_v53, %v2428_v2  ;;  %v858_v15 = vmul.f32 %v839_v26, %v2526_v40 }
 0x10a   : > { %v3454_v0 = vrot.slane %v2781_v32, 1  ;;  %1990 = vrot.lane.b32.xlu1 %v1989_v59, %s2108_s22  ;;  %v745_v7 = vmul.f32 %v727_v60, %v2422_v62  ;;  %v2820_v59 = vmul.f32 %v954_v43, %v2422_v62  ;;  %v840_v60 = vrot.slane %v2703_v39, 7 }
 0x10b   : > { %v1251_v25 = vrot.slane %v972_v3, 2 }
 0x10c   : > { %664 = vperm.xlu0 %1997, %v2255_v10   ;;  %v2816_v50 = vsel %vm1075_vm3, %v3485_v4, %v3454_v0  ;;  %v1087_v55 = vrot.slane %v745_v7, 1  ;;  %v3458_v10 = vrot.slane %v2807_v46, 1  ;;  %v2832_v53 = vpop.permute.xlu2 %984  ;;  %v1253_v7 = vrot.slane %v2820_v59, 2 }
 0x10d   : > { %v867_v8 = vpop.permute.xlu1 %866  ;;  %v841_v4 = vsel %vm536_vm2, %v838_v48, %v840_v60 }
 0x10e   : > { %v888_v31 = vrot.slane %v867_v8, 6 }
 0x110   : > { %v889_v11 = vsel %vm886_vm4, %v3457_v51, %v888_v31  ;;  %v891_v61 = vsel %vm886_vm4, %v888_v31, %v3453_v47  ;;  %2009 = vset.pattern.permute.xlu2 %v3469_v5  ;;  %v1169_v5 = vrot.slane %v858_v15, 1  ;;  %v1090_v31 = vsel %vm1075_vm3, %v1087_v55, %v3458_v10 }
 0x111   : > { %v2835_v43 = vmul.f32 %v889_v11, %v2483_v33  ;;  %v2838_v26 = vmul.f32 %v891_v61, %v2442_v18  ;;  %770 = vperm.xlu2 %2009, %v2283_v16   ;;  %v2853_v11 = vmul.f32 %v841_v4, %v2474_v13  ;;  %v3486_v61 = vrot.slane %v2741_v56, 2 }
 0x112   : > { %668 = vperm.xlu1 %1995, %v2213_v1   ;;  %v3487_v4 = vrot.slane %v2677_v63, 1  ;;  %v607_v63 = vmul.f32 %v2332_v29, %v2464_v45 }
 0x113   : > { %v3456_v8 = vrot.slane %v2835_v43, 2  ;;  %v3455_v3 = vrot.slane %v2838_v26, 2  ;;  %v1252_v48 = vsel %vm483_vm0, %v3486_v61, %v1251_v25  ;;  %v1171_v61 = vrot.slane %v2853_v11, 1  ;;  %v376_v11 = vld [vmem:[%s3422_s4 + $0xa8] sm:$0xff] }
 0x114   : > { %672 = vperm.xlu0 %1997, %v2250_v9   ;;  %v1254_v9 = vsel %vm483_vm0, %v1251_v25, %v1253_v7  ;;  %v1170_v56 = vsel %vm1075_vm3, %v3487_v4, %v1169_v5  ;;  %v418_v25 = vld [vmem:[%s3422_s4 + $0x1f8] sm:$0xff]  ;;  %v3489_v4 = vrot.slane %v2714_v36, 1 }
 0x115   : > { %v2863_v1 = vsel %vm483_vm0, %v3456_v8, %v3455_v3  ;;  %v2011_v47 = vpack.i.bf16 %v1090_v31, %v1254_v9  ;;  %v1998_v0 = vpack.i.bf16 %v1252_v48, %v1170_v56  ;;  %v3488_v8 = vmov 6   ;;  %1483 = vmatpush.msrb.mxu0 %v418_v25 }
 0x116   : > { %v2865_v15 = vpop.permute.xlu1 %939  ;;  %v1172_v29 = vsel %vm1075_vm3, %v1169_v5, %v1171_v61  ;;  %v1088_v56 = vsel %vm1075_vm3, %v3489_v4, %v1087_v55  ;;  %v1001_v25 = vrot.slane %v2657_v28, 6  ;;  %v414_v55 = vld [vmem:[%s3422_s4 + $0x1d8] sm:$0xff] }
 0x117   : > { %v2004_v10 = vpack.i.bf16 %v1172_v29, %v1088_v56  ;;  %v828_v56 = vpop.permute.xlu0 %827 }
 0x119   : > { %2012 = vrot.lane.b32.xlu2 %v2011_v47, %s2108_s22  ;;  %v417_v47 = vld [vmem:[%s3422_s4 + $0x1f0] sm:$0xff] }
 0x11a   : > { %1999 = vrot.lane.b32.xlu1 %v1998_v0, %s2108_s22  ;;  %v1957_v3 = vpop.permute.xlu2 %1956  ;;  %2018 = vset.pattern.permute.xlu2 %v3488_v8  ;;  %v416_v0 = vld [vmem:[%s3422_s4 + $0x1e8] sm:$0xff] }
 0x11b   : > { %v1958_v31 = vunpack.i.l.bf16 %v1957_v3  ;;  %2010 = vset.pattern.permute.xlu1 %v3488_v8  ;;  %1484 = vmatpush.msrb.mxu0 %v417_v47  ;;  %v1004_v8 = vrot.slane %v2832_v53, 6 }
 0x11c   : > { %2016 = vset.pattern.permute.xlu0 %v3466_v27 }
 0x11d   : > { %996 = vperm.xlu0 %2016, %v2288_v17   ;;  %v1316_v48 = vsel %vm1311_vm5, %v607_v63, %v1958_v31  ;;  %1485 = vmatpush.msrb.mxu0 %v416_v0  ;;  %v415_v31 = vld [vmem:[%s3422_s4 + $0x1e0] sm:$0xff]  ;;  %v1959_v63 = vunpack.i.h.bf16 %v1957_v3  ;;  %v608_v0 = vmul.f32 %v2339_v30, %v2428_v2 }
 0x11e   : > { %1388 = vmatmul.f32.vlgmr.msra.gmra.mxu2 %v1316_v48  ;;  %v412_v48 = vld [vmem:[%s3422_s4 + $0x1c8] sm:$0xff] }
 0x11f   : > { %v982_v9 = vpop.permute.xlu1 %981  ;;  %1486 = vmatpush.msrb.mxu0 %v415_v31  ;;  %v1317_v30 = vsel %vm1311_vm5, %v608_v0, %v1959_v63 }
 0x120   : > { %v1002_v51 = vrot.slane %v982_v9, 6 }
 0x121   : > { %884 = vperm.xlu2 %2018, %v2283_v16   ;;  %1487 = vmatpush.msrb.mxu0 %v414_v55  ;;  %v955_v55 = vrot.slane %v2865_v15, 6 }
 0x122   : > { %v1003_v5 = vsel %vm886_vm4, %v1001_v25, %v1002_v51  ;;  %v1005_v36 = vsel %vm886_vm4, %v1002_v51, %v1004_v8  ;;  %2005 = vrot.lane.b32.xlu1 %v2004_v10, %s2108_s22  ;;  %v413_v51 = vld [vmem:[%s3422_s4 + $0x1d0] sm:$0xff]  ;;  %v386_v10 = vld [vmem:[%s3422_s4 + $0xf8] sm:$0xff] }
 0x123   : > { %v2915_v47 = vmul.f32 %v1003_v5, %v2445_v19  ;;  %v2918_v3 = vmul.f32 %v1005_v36, %v2464_v45  ;;  %1401 = vmatpush.msrb.mxu2 %v386_v10  ;;  %1488 = vmatpush.msrb.mxu0 %v413_v51  ;;  %v606_v36 = vmul.f32 %v2360_v37, %v2445_v19  ;;  %v411_v51 = vld [vmem:[%s3422_s4 + $0x1c0] sm:$0xff]  ;;  %v385_v37 = vld [vmem:[%s3422_s4 + $0xf0] sm:$0xff] }
 0x125   : > { %v1295_v29 = vrot.slane %v2915_v47, 2  ;;  %2025 = vset.pattern.permute.xlu0 %v3474_v57  ;;  %v1962_v9 = vpop.permute.xlu2 %1961  ;;  %v1297_v4 = vrot.slane %v2918_v3, 2  ;;  %1489 = vmatpush.msrb.mxu0 %v412_v48  ;;  %v842_v48 = vrot.slane %v828_v56, 7  ;;  %v3490_v56 = vrot.slane %v2455_v24, 7 }
 0x126   : > { %v1964_v31 = vunpack.i.h.bf16 %v1962_v9  ;;  %v1963_v5 = vunpack.i.l.bf16 %v1962_v9  ;;  %680 = vperm.xlu0 %2025, %v2283_v16   ;;  %1391 = vmatmul.f32.gmra.mxu2 %v1317_v30  ;;  %v956_v9 = vsel %vm886_vm4, %v953_v21, %v955_v55  ;;  %v384_v30 = vld [vmem:[%s3422_s4 + $0xe8] sm:$0xff] }
 0x127   : > { %v2944_v63 = vsel %vm483_vm0, %v1295_v29, %v1297_v4  ;;  %1490 = vmatpush.msrb.mxu0 %v411_v51  ;;  %1402 = vmatpush.msrb.mxu2 %v385_v37  ;;  %v2980_v14 = vsel %vm536_vm2, %v3490_v56, 0.0  ;;  %v843_v21 = vsel %vm536_vm2, %v840_v60, %v842_v48  ;;  %v407_v60 = vld [vmem:[%s3422_s4 + $0x1a0] sm:$0xff]  ;;  %v381_v51 = vld [vmem:[%s3422_s4 + $0xd0] sm:$0xff] }
 0x128   : > { %v1328_v0 = vsel %vm1311_vm5, %v2508_v23, %v1963_v5  ;;  %v2955_v10 = vsel %vm1311_vm5, %v606_v36, %v1964_v31  ;;  %v410_v23 = vld [vmem:[%s3422_s4 + $0x1b8] sm:$0xff]  ;;  %v2986_v31 = vmul.f32 %v956_v9, %v2526_v40  ;;  %v408_v5 = vld [vmem:[%s3422_s4 + $0x1a8] sm:$0xff]  ;;  %v860_v39 = vmul.f32 %v843_v21, %v2980_v14  ;;  %v2034_v37 = vld [vmem:[%s3420_s2 + $0x30] sm:$0xff] }
 0x129   : > { %1458 = vmatmul.f32.vlgmr.msrb.gmra.mxu3 %v1328_v0  ;;  %2024 = vset.pattern.permute.xlu2 %v3466_v27  ;;  %v382_v36 = vld [vmem:[%s3422_s4 + $0xd8] sm:$0xff]  ;;  %v379_v56 = vld [vmem:[%s3422_s4 + $0xc0] sm:$0xff]  ;;  %v404_v21 = vld [vmem:[%s3422_s4 + $0x188] sm:$0xff] }
 0x12a   : > { %881 = vperm.xlu1 %2010, %v2288_v17   ;;  %999 = vperm.xlu2 %2024, %v2283_v16   ;;  %v409_v16 = vld [vmem:[%s3422_s4 + $0x1b0] sm:$0xff]  ;;  %v383_v17 = vld [vmem:[%s3422_s4 + $0xe0] sm:$0xff]  ;;  %v1255_v0 = vrot.slane %v2986_v31, 2 }
 0x12b   : > { %1491 = vmatpush.msrb.mxu0 %v410_v23  ;;  %1403 = vmatpush.msrb.mxu2 %v384_v30  ;;  %v1173_v23 = vrot.slane %v860_v39, 1  ;;  %v405_v30 = vld [vmem:[%s3422_s4 + $0x190] sm:$0xff] }
 0x12d   : > { %1492 = vmatpush.msrb.mxu0 %v409_v16  ;;  %1404 = vmatpush.msrb.mxu2 %v383_v17  ;;  %v3010_v9 = vpop.permute.xlu2 %1971  ;;  %v861_v16 = vmul.f32 0.0, %v842_v48  ;;  %v1256_v17 = vsel %vm483_vm0, %v1253_v7, %v1255_v0  ;;  %v378_v48 = vld [vmem:[%s3422_s4 + $0xb8] sm:$0xff]  ;;  %v1174_v59 = vsel %vm1075_vm3, %v1171_v61, %v1173_v23  ;;  %v403_v7 = vld [vmem:[%s3422_s4 + $0x180] sm:$0xff] }
 0x12e   : > { %2031 = vset.pattern.permute.xlu0 %v3466_v27  ;;  %v406_v27 = vld [vmem:[%s3422_s4 + $0x198] sm:$0xff] }
 0x12f   : > { %1493 = vmatpush.msrb.mxu0 %v408_v5  ;;  %1405 = vmatpush.msrb.mxu2 %v382_v36  ;;  %v2019_v5 = vpack.i.bf16 %v1256_v17, %v1174_v59  ;;  %v747_v36 = vmul.f32 %v728_v52, %v2474_v13  ;;  %v1175_v39 = vrot.slane %v861_v16, 1  ;;  %v375_v52 = vld [vmem:[%s3422_s4 + $0xa0] sm:$0xff]  ;;  %v373_v16 = vld [vmem:[%s3422_s4 + $0x90] sm:$0xff] }
 0x130   : > { %v371_v17 = vld [vmem:[%s3422_s4 + $0x80] sm:$0xff] }
 0x131   : > { %1494 = vmatpush.msrb.mxu0 %v407_v60  ;;  %1406 = vmatpush.msrb.mxu2 %v381_v51  ;;  %v377_v60 = vld [vmem:[%s3422_s4 + $0xb0] sm:$0xff]  ;;  %v1091_v61 = vrot.slane %v747_v36, 1  ;;  %v1176_v6 = vsel %vm1075_vm3, %v1173_v23, %v1175_v39  ;;  %v3063_v23 = vpop.permute.xlu1 %758  ;;  %v3492_v36 = vrot.slane %v2594_v22, 6 }
 0x132   : > { %2017 = vset.pattern.permute.xlu1 %v3474_v57  ;;  %v380_v57 = vld [vmem:[%s3422_s4 + $0xc8] sm:$0xff] }
 0x133   : > { %676 = vperm.xlu1 %2017, %v2034_v37   ;;  %1495 = vmatpush.msrb.mxu0 %v406_v27  ;;  %v3491_v27 = vrot.slane %v2807_v46, 1  ;;  %v372_v46 = vld [vmem:[%s3422_s4 + $0x88] sm:$0xff]  ;;  %v911_v39 = vmul.f32 0.0, %v3492_v36  ;;  %v1974_v36 = vunpack.i.h.bf16 %v3010_v9 }
 0x134   : > { %1407 = vmatpush.msrb.mxu2 %v380_v57  ;;  %v374_v57 = vld [vmem:[%s3422_s4 + $0x98] sm:$0xff] }
 0x135   : > { %1496 = vmatpush.msrb.mxu0 %v405_v30  ;;  %v3048_v51 = vpop.permute.xlu2 %872  ;;  %v1092_v37 = vsel %vm1075_vm3, %v3491_v27, %v1091_v61  ;;  %v421_v61 = vld [vmem:[%s3422_s4 + $0x210] sm:$0xff]  ;;  %v603_v27 = vmul.f32 0.0, %v2351_v34 }
 0x136   : > { %1408 = vmatpush.msrb.mxu2 %v379_v56  ;;  %v2026_v30 = vpack.i.bf16 %v1176_v6, %v1092_v37  ;;  %v1210_v6 = vrot.slane %v911_v39, 2 }
 0x137   : > { %1497 = vmatpush.msrb.mxu0 %v404_v21  ;;  %v426_v21 = vld [vmem:[%s3422_s4 + $0x238] sm:$0xff] }
 0x138   : > { %1409 = vmatpush.msrb.mxu2 %v378_v48  ;;  %1532 = vmatpush.msrb.mxu1 %v426_v21  ;;  %v425_v48 = vld [vmem:[%s3422_s4 + $0x230] sm:$0xff] }
 0x139   : > { %1498 = vmatpush.msrb.mxu0 %v403_v7  ;;  %v424_v7 = vld [vmem:[%s3422_s4 + $0x228] sm:$0xff] }
 0x13a   : > { %1410 = vmatpush.msrb.mxu2 %v377_v60  ;;  %1533 = vmatpush.msrb.mxu1 %v425_v48 }
 0x13b   : > { %2020 = vrot.lane.b32.xlu1 %v2019_v5, %s2108_s22  ;;  %v423_v5 = vld [vmem:[%s3422_s4 + $0x220] sm:$0xff] }
 0x13c   : > { %1411 = vmatpush.msrb.mxu2 %v376_v11  ;;  %1534 = vmatpush.msrb.mxu1 %v424_v7  ;;  %v422_v11 = vld [vmem:[%s3422_s4 + $0x218] sm:$0xff] }
 0x13e   : > { %1412 = vmatpush.msrb.mxu2 %v375_v52  ;;  %v3072_v56 = vpop.permute.xlu2 %987  ;;  %1535 = vmatpush.msrb.mxu1 %v423_v5  ;;  %v1973_v5 = vunpack.i.l.bf16 %v3010_v9 }
 0x140   : > { %1413 = vmatpush.msrb.mxu2 %v374_v57  ;;  %1536 = vmatpush.msrb.mxu1 %v422_v11  ;;  %v609_v57 = vmul.f32 %v2372_v42, %v2422_v62  ;;  %v3493_v42 = vrot.slane %v2835_v43, 2  ;;  %v610_v43 = vmul.f32 %v2369_v41, %v2526_v40 }
 0x142   : > { %1414 = vmatpush.msrb.mxu2 %v373_v16  ;;  %1537 = vmatpush.msrb.mxu1 %v421_v61  ;;  %v1212_v48 = vsel %vm483_vm0, %v1210_v6, %v3493_v42  ;;  %v604_v61 = vmul.f32 %v2363_v38, %v2483_v33  ;;  %v683_v42 = vmul.f32 %v2563_v20, %v2442_v18 }
 0x143   : > { %2027 = vrot.lane.b32.xlu1 %v2026_v30, %s2108_s22  ;;  %v420_v30 = vld [vmem:[%s3422_s4 + $0x208] sm:$0xff] }
 0x144   : > { %1415 = vmatpush.msrb.mxu2 %v372_v46  ;;  %1538 = vmatpush.msrb.mxu1 %v420_v30  ;;  %v419_v46 = vld [vmem:[%s3422_s4 + $0x200] sm:$0xff]  ;;  %v1313_v6 = vsel %vm1311_vm5, %v604_v61, %v1973_v5  ;;  %v777_v30 = vrot.slane %v3063_v23, 7  ;;  %v684_v61 = vmul.f32 %v2727_v54, %v2445_v19 }
 0x146   : > { %1416 = vmatpush.msrb.mxu2 %v371_v17  ;;  %1539 = vmatpush.msrb.mxu1 %v419_v46 }
 0x147   : > { %v3090_v60 = vpop.permute.xlu2 %764 }
 0x14b   : > { %v3080_v59 = vpop.permute.xlu1 %1938 }
 0x14c   : > { %v1941_v15 = vunpack.i.h.bf16 %v3080_v59 }
 0x150   : > { %v3118_v39 = vpop.permute.xlu2 %990 }
 0x153   : > { %v1949_v52 = vpop.permute.xlu1 %1948 }
 0x154   : > { %v1951_v37 = vunpack.i.h.bf16 %v1949_v52  ;;  %v1950_v22 = vunpack.i.l.bf16 %v1949_v52 }
 0x155   : > { %v3104_v16 = vpop.permute.xlu0 %1943 }
 0x156   : > { %v1945_v17 = vunpack.i.l.bf16 %v3104_v16  ;;  %v1312_v34 = vsel %vm1311_vm5, %v603_v27, %v1950_v22  ;;  %v1318_v21 = vsel %vm1311_vm5, %v609_v57, %v1951_v37  ;;  %v1319_v57 = vsel %vm1311_vm5, %v610_v43, %v1974_v36 }
 0x157   : > { %1376 = vmatmul.f32.vlgmr.msra.gmra.mxu1 %v1312_v34  ;;  %1394 = vmatmul.f32.gmra.mxu2 %v1318_v21 }
 0x158   : > { %v1336_v7 = vsel %vm1311_vm5, %v1212_v48, %v1945_v17  ;;  %v3494_v17 = vrot.slane %v2749_v58, 7  ;;  %v605_v58 = vmul.f32 %v2353_v35, %v2442_v18 }
 0x159   : > { %1499 = vmatmul.f32.vlgmr.msrb.gmra.mxu0 %v1336_v7  ;;  %v1320_v7 = vsel %vm1311_vm5, %v683_v42, %v1941_v15  ;;  %v1008_v42 = vrot.slane %v3118_v39, 6 }
 0x15a   : > { %v778_v34 = vsel %vm536_vm2, %v3494_v17, %v777_v30 }
 0x15b   : > { %v943_v11 = vpop.permute.xlu1 %942  ;;  %v799_v31 = vmul.f32 %v778_v34, %v2464_v45 }
 0x15c   : > { %v957_v52 = vrot.slane %v943_v11, 6 }
 0x15d   : > { %v1967_v27 = vpop.permute.xlu0 %1966  ;;  %v1131_v5 = vrot.slane %v799_v31, 1 }
 0x15e   : > { %v958_v37 = vsel %vm886_vm4, %v955_v55, %v957_v52  ;;  %v976_v22 = vmul.f32 %v957_v52, %v2980_v14  ;;  %v1969_v9 = vunpack.i.h.bf16 %v1967_v27  ;;  %v1940_v55 = vunpack.i.l.bf16 %v3080_v59 }
 0x15f   : > { %v975_v33 = vmul.f32 %v958_v37, %v2474_v13  ;;  %1379 = vmatmul.f32.gmra.mxu1 %v1313_v6  ;;  %1397 = vmatmul.f32.gmra.mxu2 %v1319_v57  ;;  %v1968_v36 = vunpack.i.l.bf16 %v1967_v27  ;;  %v3495_v57 = vrot.slane %v2781_v32, 1 }
 0x160   : > { %v1259_v38 = vrot.slane %v976_v22, 2  ;;  %v1329_v41 = vsel %vm1311_vm5, %v2816_v50, %v1969_v9  ;;  %v3145_v50 = vpop.permute.xlu2 %767 }
 0x161   : > { %1461 = vmatmul.f32.gmra.mxu3 %v1329_v41  ;;  %v1257_v46 = vrot.slane %v975_v33, 2  ;;  %v1321_v9 = vsel %vm1311_vm5, %v684_v61, %v1968_v36  ;;  %v1132_v27 = vsel %vm1075_vm3, %v3495_v57, %v1131_v5  ;;  %v3496_v41 = vrot.slane %v2763_v12, 6 }
 0x162   : > { %v1946_v12 = vunpack.i.h.bf16 %v3104_v16 }
 0x163   : > { %v1260_v23 = vsel %vm483_vm0, %v1257_v46, %v1259_v38  ;;  %v1258_v21 = vsel %vm483_vm0, %v1255_v0, %v1257_v46  ;;  %v1314_v0 = vsel %vm1311_vm5, %v605_v58, %v1940_v55  ;;  %v1025_v38 = vmul.f32 %v1001_v25, %v2442_v18 }
 0x164   : > { %v3147_v48 = vpop.permute.xlu1 %761  ;;  %1275 = vrot.lane.b32.xlu1 %v1260_v23, %s2108_s22  ;;  %1273 = vrot.lane.b32.xlu2 %v1258_v21, %s2108_s22  ;;  %v3497_v58 = vrot.slane %v2838_v26, 2 }
 0x165   : > { %v3153_v59 = vpop.permute.xlu0 %875  ;;  %v779_v20 = vrot.slane %v3147_v48, 7  ;;  %v1294_v46 = vrot.slane %v1025_v38, 2 }
 0x167   : > { %1382 = vmatmul.f32.gmra.mxu1 %v1314_v0  ;;  %1417 = vmatmul.f32.vlgmr.msrb.gmra.mxu2 %v1320_v7  ;;  %v780_v11 = vsel %vm536_vm2, %v777_v30, %v779_v20  ;;  %v892_v30 = vrot.slane %v3048_v51, 6  ;;  %v1296_v18 = vsel %vm483_vm0, %v1294_v46, %v1295_v29  ;;  %v894_v0 = vrot.slane %v3153_v59, 6 }
 0x168   : > { %v3164_v37 = vpop.permute.xlu2 %993  ;;  %v3167_v22 = vmul.f32 %v780_v11, %v2428_v2 }
 0x169   : > { %v893_v51 = vsel %vm886_vm4, %v3496_v41, %v892_v30  ;;  %v895_v61 = vsel %vm886_vm4, %v892_v30, %v894_v0  ;;  %v783_v30 = vrot.slane %v3145_v50, 7 }
 0x16a   : > { %v1133_v32 = vrot.slane %v3167_v22, 1  ;;  %v3186_v55 = vmul.f32 %v893_v51, %v2445_v19 }
 0x16c   : > { %v1978_v35 = vpop.permute.xlu1 %1977  ;;  %v1134_v28 = vsel %vm1075_vm3, %v1131_v5, %v1133_v32  ;;  %v1215_v47 = vrot.slane %v3186_v55, 2 }
 0x16d   : > { %v1980_v52 = vunpack.i.h.bf16 %v1978_v35  ;;  %v1979_v43 = vunpack.i.l.bf16 %v1978_v35  ;;  %v3162_v6 = vpop.permute.xlu0 %878 }
 0x16e   : > { %v1216_v31 = vsel %vm483_vm0, %v3497_v58, %v1215_v47  ;;  %v896_v57 = vrot.slane %v3162_v6, 6 }
 0x16f   : > { %1385 = vmatmul.f32.gmra.mxu1 %v2955_v10  ;;  %1420 = vmatmul.f32.gmra.mxu2 %v1321_v9  ;;  %v1330_v54 = vsel %vm1311_vm5, %v1132_v27, %v1979_v43  ;;  %v1337_v33 = vsel %vm1311_vm5, %v2863_v1, %v1980_v52  ;;  %v1006_v1 = vrot.slane %v3072_v56, 6  ;;  %v915_v9 = vmul.f32 %v895_v61, %v2464_v45 }
 0x170   : > { %1464 = vmatmul.f32.gmra.mxu3 %v1330_v54  ;;  %1502 = vmatmul.f32.gmra.mxu0 %v1337_v33  ;;  %v3199_v34 = vpop.permute.xlu2 %770  ;;  %v897_v38 = vsel %vm886_vm4, %v894_v0, %v896_v57 }
 0x171   : > { %v1007_v29 = vsel %vm886_vm4, %v1004_v8, %v1006_v1  ;;  %v781_v8 = vrot.slane %v3090_v60, 7  ;;  %v1009_v26 = vsel %vm886_vm4, %v1006_v1, %v1008_v42 }
 0x172   : > { %v1028_v16 = vmul.f32 %v1007_v29, %v2428_v2  ;;  %v1029_v60 = vmul.f32 %v1009_v26, %v2422_v62 }
 0x173   : > { %v782_v59 = vsel %vm536_vm2, %v779_v20, %v781_v8  ;;  %v1010_v20 = vrot.slane %v3164_v37, 6  ;;  %v784_v46 = vsel %vm536_vm2, %v781_v8, %v783_v30 }
 0x174   : > { %v1984_v10 = vpop.permute.xlu1 %1983  ;;  %v1299_v36 = vrot.slane %v1028_v16, 2  ;;  %v801_v43 = vmul.f32 %v782_v59, %v2422_v62 }
 0x175   : > { %v1986_v15 = vunpack.i.h.bf16 %v1984_v10  ;;  %v1985_v7 = vunpack.i.l.bf16 %v1984_v10  ;;  %v1011_v41 = vsel %vm886_vm4, %v1008_v42, %v1010_v20  ;;  %v3243_v10 = vmul.f32 %v897_v38, %v2428_v2 }
 0x176   : > { %v661_v17 = vpop.permute.xlu0 %660  ;;  %v1300_v52 = vsel %vm483_vm0, %v1297_v4, %v1299_v36  ;;  %v1135_v33 = vrot.slane %v801_v43, 1  ;;  %v1217_v4 = vrot.slane %v915_v9, 2  ;;  %v1030_v55 = vmul.f32 %v1011_v41, %v2526_v40 }
 0x177   : > { %v685_v25 = vmul.f32 %v661_v17, %v2464_v45  ;;  %1817 = vmatmul.msk.f32.vlgmr.msrb.gmra.mxu1 %vm1311_vm5, %v1296_v18  ;;  %v1331_v19 = vsel %vm1311_vm5, %v1134_v28, %v1986_v15  ;;  %v1301_v45 = vrot.slane %v1029_v60, 2 }
 0x178   : > { %1467 = vmatmul.f32.gmra.mxu3 %v1331_v19  ;;  %v3218_v11 = vpop.permute.xlu2 %2012  ;;  %v1136_v17 = vsel %vm1075_vm3, %v1133_v32, %v1135_v33  ;;  %v1218_v18 = vsel %vm483_vm0, %v1215_v47, %v1217_v4  ;;  %v1303_v29 = vrot.slane %v1030_v55, 2 }
 0x179   : > { %v1322_v56 = vsel %vm1311_vm5, %v685_v25, %v1946_v12  ;;  %v1302_v1 = vsel %vm483_vm0, %v1299_v36, %v1301_v45  ;;  %v802_v25 = vmul.f32 %v784_v46, %v2526_v40  ;;  %v2014_v47 = vunpack.i.l.bf16 %v3218_v11 }
 0x17a   : > { %1423 = vmatmul.f32.gmra.mxu2 %v1322_v56  ;;  %v1219_v56 = vrot.slane %v3243_v10, 2  ;;  %v1304_v0 = vsel %vm483_vm0, %v1301_v45, %v1303_v29 }
 0x17b   : > { %v1137_v32 = vrot.slane %v802_v25, 1 }
 0x17c   : > { %v1991_v23 = vpop.permute.xlu1 %1990  ;;  %v1220_v58 = vsel %vm483_vm0, %v1217_v4, %v1219_v56 }
 0x17d   : > { %v1992_v21 = vunpack.i.l.bf16 %v1991_v23  ;;  %v1993_v54 = vunpack.i.h.bf16 %v1991_v23 }
 0x17e   : > { %v665_v48 = vpop.permute.xlu0 %664 }
 0x17f   : > { %v686_v5 = vmul.f32 %v665_v48, %v2428_v2  ;;  %1818 = vmatmul.msk.f32.gmra.mxu1 %vm1311_vm5, %v2944_v63  ;;  %v1338_v53 = vsel %vm1311_vm5, %v1216_v31, %v1992_v21 }
 0x180   : > { %1505 = vmatmul.f32.gmra.mxu0 %v1338_v53  ;;  %v3239_v51 = vpop.permute.xlu2 %884 }
 0x181   : > { %v1323_v39 = vsel %vm1311_vm5, %v686_v5, %v1985_v7  ;;  %v1138_v7 = vsel %vm1075_vm3, %v1135_v33, %v1137_v32  ;;  %v900_v55 = vrot.slane %v3239_v51, 6 }
 0x182   : > { %1426 = vmatmul.f32.gmra.mxu2 %v1323_v39  ;;  %v1340_v39 = vsel %vm1311_vm5, %v1220_v58, %v2014_v47 }
 0x184   : > { %v669_v35 = vpop.permute.xlu1 %668 }
 0x185   : > { %v687_v63 = vmul.f32 %v669_v35, %v2422_v62 }
 0x186   : > { %v673_v27 = vpop.permute.xlu0 %672 }
 0x187   : > { %1819 = vmatmul.msk.f32.gmra.mxu1 %vm1311_vm5, %v1300_v52  ;;  %v1324_v3 = vsel %vm1311_vm5, %v687_v63, %v1993_v54  ;;  %v688_v21 = vmul.f32 %v673_v27, %v2526_v40  ;;  %v785_v63 = vrot.slane %v3199_v34, 7 }
 0x188   : > { %v1000_v23 = vpop.permute.xlu2 %999 }
 0x189   : > { %v1014_v5 = vrot.slane %v1000_v23, 6  ;;  %v786_v43 = vsel %vm536_vm2, %v783_v30, %v785_v63  ;;  %v804_v46 = vmul.f32 %v785_v63, %v2980_v14 }
 0x18a   : > { %1429 = vmatmul.f32.gmra.mxu2 %v1324_v3  ;;  %v803_v4 = vmul.f32 %v786_v43, %v2474_v13 }
 0x18b   : > { %v1033_v54 = vmul.f32 0.0, %v1014_v5 }
 0x18c   : > { %v2000_v37 = vpop.permute.xlu1 %1999  ;;  %v1139_v38 = vrot.slane %v803_v4, 1 }
 0x18d   : > { %v2002_v50 = vunpack.i.h.bf16 %v2000_v37  ;;  %v2001_v15 = vunpack.i.l.bf16 %v2000_v37  ;;  %v1309_v6 = vrot.slane %v1033_v54, 2 }
 0x18e   : > { %v1140_v10 = vsel %vm1075_vm3, %v1137_v32, %v1139_v38  ;;  %v427_v32 = vld [vmem:[%s3423_s5] sm:$0xf] }
 0x18f   : > { %v997_v28 = vpop.permute.xlu0 %996  ;;  %1820 = vmatmul.msk.f32.gmra.mxu1 %vm1311_vm5, %v1302_v1  ;;  %v1332_v12 = vsel %vm1311_vm5, %v1136_v17, %v2001_v15  ;;  %v1339_v2 = vsel %vm1311_vm5, %v1218_v18, %v2002_v50  ;;  %v1141_v1 = vrot.slane %v804_v46, 1  ;;  %1825 = vmatpush.msk.msra.mxu0 %vm1610_vm6, %v427_v32 }
 0x190   : > { %v1012_v19 = vrot.slane %v997_v28, 6  ;;  %1470 = vmatmul.f32.gmra.mxu3 %v1332_v12  ;;  %1508 = vmatmul.f32.gmra.mxu0 %v1339_v2 }
 0x192   : > { %v1013_v22 = vsel %vm886_vm4, %v1010_v20, %v1012_v19  ;;  %v1015_v26 = vsel %vm886_vm4, %v1012_v19, %v1014_v5  ;;  %v2015_v20 = vunpack.i.h.bf16 %v3218_v11 }
 0x193   : > { %v1031_v31 = vmul.f32 %v1013_v22, %v2474_v13  ;;  %v1032_v61 = vmul.f32 %v1015_v26, %v2980_v14 }
 0x194   : > { %v2006_v16 = vpop.permute.xlu1 %2005 }
 0x195   : > { %v2008_v42 = vunpack.i.h.bf16 %v2006_v16  ;;  %v2007_v48 = vunpack.i.l.bf16 %v2006_v16  ;;  %v1305_v36 = vrot.slane %v1031_v31, 2  ;;  %v1307_v60 = vrot.slane %v1032_v61, 2 }
 0x196   : > { %v919_v16 = vmul.f32 %v900_v55, %v2474_v13 }
 0x197   : > { %1821 = vmatmul.msk.f32.gmra.mxu1 %vm1311_vm5, %v1304_v0  ;;  %v1325_v53 = vsel %vm1311_vm5, %v688_v21, %v2007_v48  ;;  %v1333_v8 = vsel %vm1311_vm5, %v1138_v7, %v2008_v42  ;;  %v1306_v35 = vsel %vm483_vm0, %v1303_v29, %v1305_v36  ;;  %v1308_v33 = vsel %vm483_vm0, %v1305_v36, %v1307_v60 }
 0x198   : > { %1432 = vmatmul.f32.gmra.mxu2 %v1325_v53  ;;  %1473 = vmatmul.f32.gmra.mxu3 %v1333_v8  ;;  %v1310_v37 = vsel %vm483_vm0, %v1307_v60, %v1309_v6  ;;  %v681_v17 = vpop.permute.xlu0 %680  ;;  %v1225_v42 = vrot.slane %v919_v16, 2  ;;  %v1605_v53 = vld [vmem:[%s347_s25] sm:$0xff]  ;;  %s1726_s25 = sshll.u32 %s338_s23, 4  ;;  %s1727_s25 = int_to_ptr.vmem [resolvable:$true] %s1726_s25 }
 0x199   : > { %1511 = vmatmul.f32.gmra.mxu0 %v1340_v39  ;;  %v690_v12 = vmul.f32 %v681_v17, %v2980_v14 }
 0x19c   : > { %v882_v59 = vpop.permute.xlu1 %881 }
 0x19d   : > { %v898_v52 = vrot.slane %v882_v59, 6 }
 0x19f   : > { %1822 = vmatmul.msk.f32.gmra.mxu1 %vm1311_vm5, %v1306_v35  ;;  %v899_v9 = vsel %vm886_vm4, %v896_v57, %v898_v52  ;;  %v901_v18 = vsel %vm886_vm4, %v898_v52, %v900_v55 }
 0x1a0   : > { %v917_v34 = vmul.f32 %v899_v9, %v2422_v62  ;;  %v918_v2 = vmul.f32 %v901_v18, %v2526_v40 }
 0x1a1   : > { %v1389_v23 = vpop.f32.mrf.mxu2 }
 0x1a2   : > { %v1221_v57 = vrot.slane %v917_v34, 2  ;;  %v1223_v51 = vrot.slane %v918_v2, 2 }
 0x1a4   : > { %v1222_v62 = vsel %vm483_vm0, %v1219_v56, %v1221_v57  ;;  %v1142_v56 = vsel %vm1075_vm3, %v1139_v38, %v1141_v1  ;;  %v1224_v40 = vsel %vm483_vm0, %v1221_v57, %v1223_v51  ;;  %v1226_v31 = vsel %vm483_vm0, %v1223_v51, %v1225_v42 }
 0x1a5   : > { %v677_v27 = vpop.permute.xlu1 %676 }
 0x1a6   : > { %v689_v3 = vmul.f32 %v677_v27, %v2474_v13 }
 0x1a7   : > { %1823 = vmatmul.msk.f32.gmra.mxu1 %vm1311_vm5, %v1308_v33 }
 0x1a8   : > { %v1326_v30 = vsel %vm1311_vm5, %v689_v3, %v2015_v20 }
 0x1a9   : > { %1435 = vmatmul.f32.gmra.mxu2 %v1326_v30  ;;  %v3303_v21 = vpop.f32.mrf.mxu2 }
 0x1ac   : > { %v1459_v59 = vpop.f32.mrf.mxu3 }
 0x1ad   : > { %v2021_v45 = vpop.permute.xlu1 %2020 }
 0x1ae   : > { %v2023_v41 = vunpack.i.h.bf16 %v2021_v45  ;;  %v2022_v11 = vunpack.i.l.bf16 %v2021_v45 }
 0x1af   : > { %1824 = vmatmul.msk.f32.gmra.mxu1 %vm1311_vm5, %v1310_v37 }
 0x1b0   : > { %v1334_v50 = vsel %vm1311_vm5, %v1140_v10, %v2022_v11  ;;  %v1341_v15 = vsel %vm1311_vm5, %v1222_v62, %v2023_v41 }
 0x1b1   : > { %1476 = vmatmul.f32.gmra.mxu3 %v1334_v50  ;;  %1514 = vmatmul.f32.gmra.mxu0 %v1341_v15 }
 0x1b5   : > { %v2028_v28 = vpop.permute.xlu1 %2027 }
 0x1b6   : > { %v2030_v25 = vunpack.i.h.bf16 %v2028_v28  ;;  %v2029_v19 = vunpack.i.l.bf16 %v2028_v28 }
 0x1b8   : > { %v1327_v29 = vsel %vm1311_vm5, %v690_v12, %v2029_v19  ;;  %v1335_v22 = vsel %vm1311_vm5, %v1142_v56, %v2030_v25 }
 0x1b9   : > { %1438 = vmatmul.f32.gmra.mxu2 %v1327_v29  ;;  %1479 = vmatmul.f32.gmra.mxu3 %v1335_v22 }
 0x1be   : > { %v1274_v14 = vpop.permute.xlu2 %1273 }
 0x1bf   : > { %v1342_v47 = vsel %vm1311_vm5, %v1224_v40, %v1274_v14 }
 0x1c0   : > { %1517 = vmatmul.f32.gmra.mxu0 %v1342_v47 }
 0x1d4   : > { %v1377_v48 = vpop.f32.mrf.mxu1 }
 0x1d6   : > { %v1276_v58 = vpop.permute.xlu1 %1275  ;;  %v1500_v35 = vpop.f32.mrf.mxu0 }
 0x1d7   : > { %v1343_v0 = vsel %vm1311_vm5, %v1226_v31, %v1276_v58 }
 0x1d8   : > { %1520 = vmatmul.f32.gmra.mxu0 %v1343_v0 }
 0x1da   : > { %v3308_v7 = vpop.f32.mrf.mxu2 }
 0x1dc   : > { %v1380_v5 = vpop.f32.mrf.mxu1 }
 0x1e0   : > { %1826 = vmatmul.msk.f32.vlgmr.msra.gmra.mxu0 %vm1606_vm7, %v1605_v53 }
 0x1e2   : > { %v3313_v13 = vpop.f32.mrf.mxu2 }
 0x1e4   : > { %v1383_v8 = vpop.f32.mrf.mxu1  ;;  %v1462_v27 = vpop.f32.mrf.mxu3 }
 0x1ea   : > { %v1418_v39 = vpop.f32.mrf.mxu2 }
 0x1eb   : > { %v1419_v36 = vadd.f32 %v1418_v39, %v1377_v48 }
 0x1ec   : > { %v1386_v26 = vpop.f32.mrf.mxu1 }
 0x1ed   : > { %v1460_v61 = vadd.f32 %v1459_v59, %v1419_v36  ;;  %v1503_v54 = vpop.f32.mrf.mxu0 }
 0x1ef   : > { %v1501_v60 = vadd.f32 %v1500_v35, %v1460_v61 }
 0x1f2   : > { %v1421_v63 = vpop.f32.mrf.mxu2 }
 0x1f3   : > { %v1422_v52 = vadd.f32 %v1421_v63, %v1380_v5  ;;  %v1465_v6 = vpop.f32.mrf.mxu3  ;;  %v438_v63 = vld [vmem:[%s3425_s7 + $0x50] sm:$0xff] }
 0x1f4   : > { %v1541_v43 = vpop.f32.mrf.mxu1 }
 0x1f5   : > { %v1542_v9 = vadd.f32 %v1541_v43, %v1501_v60  ;;  %v1463_v20 = vadd.f32 %v1462_v27, %v1422_v52  ;;  %v436_v52 = vld [vmem:[%s3425_s7 + $0x40] sm:$0xff]  ;;  %v435_v60 = vld [vmem:[%s3425_s7 + $0x38] sm:$0xff]  ;;  %v434_v43 = vld [vmem:[%s3425_s7 + $0x30] sm:$0xff] }
 0x1f6   : > { %v432_v27 = vld [vmem:[%s3425_s7 + $0x20] sm:$0xff] }
 0x1f7   : > { %1573 = vrot.lane.b32.xlu2 %v1542_v9, %s2108_s22  ;;  %v1504_v3 = vadd.f32 %v1503_v54, %v1463_v20  ;;  %v433_v9 = vld [vmem:[%s3425_s7 + $0x28] sm:$0xff]  ;;  %v431_v20 = vld [vmem:[%s3425_s7 + $0x18] sm:$0xff]  ;;  %v430_v54 = vld [vmem:[%s3425_s7 + $0x10] sm:$0xff] }
 0x1fb   : > { %v1468_v10 = vpop.f32.mrf.mxu3 }
 0x1fc   : > { %v1544_v33 = vpop.f32.mrf.mxu1 }
 0x1fd   : > { %v1545_v4 = vadd.f32 %v1544_v33, %v1504_v3  ;;  %v1424_v34 = vpop.f32.mrf.mxu2  ;;  %v1506_v57 = vpop.f32.mrf.mxu0  ;;  %v429_v3 = vld [vmem:[%s3425_s7 + $0x8] sm:$0xff]  ;;  %v428_v33 = vld [vmem:[%s3425_s7] sm:$0xff] }
 0x1fe   : > { %v1425_v30 = vadd.f32 %v1424_v34, %v1383_v8 }
 0x1ff   : > { %1575 = vrot.lane.b32.xlu0 %v1545_v4, %s2108_s22 }
 0x200   : > { %v1466_v38 = vadd.f32 %v1465_v6, %v1425_v30 }
 0x202   : > { %v1507_v45 = vadd.f32 %v1506_v57, %v1466_v38 }
 0x204   : > { %v1547_v41 = vpop.f32.mrf.mxu1 }
 0x205   : > { %v1548_v11 = vadd.f32 %v1547_v41, %v1507_v45  ;;  %v1427_v37 = vpop.f32.mrf.mxu2 }
 0x206   : > { %v1428_v46 = vadd.f32 %v1427_v37, %v1386_v26 }
 0x207   : > { %1577 = vrot.lane.b32.xlu1 %v1548_v11, %s2108_s22  ;;  %v2032_v11 = vld [vmem:[%s3424_s6] ss:$0 sm:$0xff] }
 0x208   : > { %v1469_v62 = vadd.f32 %v1468_v10, %v1428_v46  ;;  %v3498_v10 = vld [vmem:[#allocation7_spill] sm:$0xff] }
 0x20c   : > { %v1550_v15 = vpop.f32.mrf.mxu1 }
 0x20d   : > { %v1509_v50 = vpop.f32.mrf.mxu0  ;;  %v1430_v1 = vpop.f32.mrf.mxu2 }
 0x20e   : > { %v1510_v55 = vadd.f32 %v1509_v50, %v1469_v62  ;;  %v1431_v18 = vadd.f32 %v1430_v1, %v1389_v23 }
 0x210   : > { %v1551_v17 = vadd.f32 %v1550_v15, %v1510_v55 }
 0x212   : > { %1579 = vrot.lane.b32.xlu2 %v1551_v17, %s2108_s22 }
 0x213   : > { %v1471_v28 = vpop.f32.mrf.mxu3 }
 0x214   : > { %v1472_v12 = vadd.f32 %v1471_v28, %v1431_v18  ;;  %v1553_v19 = vpop.f32.mrf.mxu1 }
 0x216   : > { %v1512_v2 = vpop.f32.mrf.mxu0 }
 0x217   : > { %v1513_v25 = vadd.f32 %v1512_v2, %v1472_v12  ;;  %v3499_v2 = vld [vmem:[#allocation9_spill] sm:$0xff] }
 0x219   : > { %v1554_v56 = vadd.f32 %v1553_v19, %v1513_v25  ;;  %v3500_v25 = vld [vmem:[#allocation5_spill] sm:$0xff] }
 0x21b   : > { %1581 = vrot.lane.b32.xlu0 %v1554_v56, %s2108_s22  ;;  %v1433_v29 = vpop.f32.mrf.mxu2  ;;  %v1474_v51 = vpop.f32.mrf.mxu3 }
 0x21c   : > { %v1434_v22 = vadd.f32 %v1433_v29, %v3303_v21  ;;  %v1556_v47 = vpop.f32.mrf.mxu1 }
 0x21e   : > { %v1475_v32 = vadd.f32 %v1474_v51, %v1434_v22  ;;  %v3501_v22 = vld [vmem:[#allocation6_spill] sm:$0xff] }
 0x224   : > { %v1559_v5 = vpop.f32.mrf.mxu1 }
 0x22c   : > { %v1436_v23 = vpop.f32.mrf.mxu2  ;;  %v1562_v61 = vpop.f32.mrf.mxu1 }
 0x22d   : > { %v1437_v48 = vadd.f32 %v1436_v23, %v3308_v7  ;;  %v439_v7 = vld [vmem:[%s3425_s7 + $0x58] sm:$0xff] }
 0x22e   : > { %v1515_v14 = vpop.f32.mrf.mxu0  ;;  %1669 = vmatpush.msra.mxu3 %v439_v7 }
 0x22f   : > { %v1516_v40 = vadd.f32 %v1515_v14, %v1475_v32 }
 0x230   : > { %1670 = vmatpush.msra.mxu3 %v438_v63 }
 0x231   : > { %v1557_v16 = vadd.f32 %v1556_v47, %v1516_v40 }
 0x233   : > { %1583 = vrot.lane.b32.xlu1 %v1557_v16, %s2108_s22 }
 0x234   : > { %v1477_v42 = vpop.f32.mrf.mxu3 }
 0x235   : > { %v1478_v58 = vadd.f32 %v1477_v42, %v1437_v48  ;;  %v3502_v48 = vld [vmem:[#allocation8_spill] sm:$0xff] }
 0x23c   : > { %v1439_v21 = vpop.f32.mrf.mxu2  ;;  %v1480_v39 = vpop.f32.mrf.mxu3 }
 0x23d   : > { %v1518_v31 = vpop.f32.mrf.mxu0  ;;  %v1440_v8 = vadd.f32 %v1439_v21, %v3313_v13  ;;  %v437_v13 = vld [vmem:[%s3425_s7 + $0x48] sm:$0xff] }
 0x23e   : > { %v1519_v0 = vadd.f32 %v1518_v31, %v1478_v58  ;;  %1671 = vmatpush.msra.mxu3 %v437_v13 }
 0x23f   : > { %v1481_v36 = vadd.f32 %v1480_v39, %v1440_v8 }
 0x240   : > { %v1560_v53 = vadd.f32 %v1559_v5, %v1519_v0  ;;  %1672 = vmatpush.msra.mxu3 %v436_v52 }
 0x242   : > { %1585 = vrot.lane.b32.xlu2 %v1560_v53, %s2108_s22  ;;  %1673 = vmatpush.msra.mxu3 %v435_v60 }
 0x244   : > { %1674 = vmatpush.msra.mxu3 %v434_v43 }
 0x246   : > { %1675 = vmatpush.msra.mxu3 %v433_v9 }
 0x248   : > { %1676 = vmatpush.msra.mxu3 %v432_v27 }
 0x24a   : > { %1677 = vmatpush.msra.mxu3 %v431_v20 }
 0x24c   : > { %1678 = vmatpush.msra.mxu3 %v430_v54 }
 0x24e   : > { %1679 = vmatpush.msra.mxu3 %v429_v3 }
 0x250   : > { %1680 = vmatpush.msra.mxu3 %v428_v33 }
 0x251   : > { %v1574_v34 = vpop.permute.xlu2 %1573 }
 0x252   : > { %v1597_v45 = vsel %vm1311_vm5, %v2379_v44, %v1574_v34 }
 0x255   : > { %v1521_v26 = vpop.f32.mrf.mxu0 }
 0x256   : > { %v1522_v59 = vadd.f32 %v1521_v26, %v1481_v36 }
 0x258   : > { %v1563_v35 = vadd.f32 %v1562_v61, %v1522_v59  ;;  %v2033_v59 = vld [vmem:[%s3426_s8] ss:$0 sm:$0xff] }
 0x25a   : > { %1587 = vrot.lane.b32.xlu0 %v1563_v35, %s2108_s22 }
 0x25d   : > { %v1631_v4 = vpop.f32.mrf.mxu0 }
 0x25e   : > { %v1637_v30 = vperm.slane %v1631_v4, 0  ;;  %v1640_v38 = vperm.slane %v1631_v4, 1  ;;  %v1643_v46 = vperm.slane %v1631_v4, 2  ;;  %v1646_v18 = vperm.slane %v1631_v4, 3 }
 0x25f   : > { %v1649_v44 = vperm.slane %v1631_v4, 4  ;;  %v1652_v29 = vperm.slane %v1631_v4, 5  ;;  %v1655_v42 = vperm.slane %v1631_v4, 6  ;;  %v1658_v5 = vperm.slane %v1631_v4, 7 }
 0x260   : > { %v1638_v37 = vmul.f32 %v1637_v30, %v1597_v45 }
 0x262   : > { %v1639_v55 = vadd.f32 %v2032_v11, %v1638_v37 }
 0x26c   : > { %v1580_v15 = vpop.permute.xlu2 %1579 }
 0x271   : > { %v1576_v6 = vpop.permute.xlu0 %1575 }
 0x272   : > { %v1598_v41 = vsel %vm1311_vm5, %v2389_v49, %v1576_v6  ;;  %v1600_v49 = vsel %vm1311_vm5, %v3499_v2, %v1580_v15 }
 0x273   : > { %v1641_v50 = vmul.f32 %v1640_v38, %v1598_v41  ;;  %v1647_v32 = vmul.f32 %v1646_v18, %v1600_v49 }
 0x275   : > { %v1642_v28 = vadd.f32 %v1641_v50, %v1639_v55 }
 0x279   : > { %v1578_v57 = vpop.permute.xlu1 %1577 }
 0x27a   : > { %v1599_v62 = vsel %vm1311_vm5, %v3498_v10, %v1578_v57 }
 0x27b   : > { %v1644_v1 = vmul.f32 %v1643_v46, %v1599_v62 }
 0x27d   : > { %v1645_v56 = vadd.f32 %v1644_v1, %v1642_v28 }
 0x27f   : > { %v1648_v40 = vadd.f32 %v1647_v32, %v1645_v56 }
 0x28d   : > { %v1582_v17 = vpop.permute.xlu0 %1581 }
 0x28e   : > { %v1601_v19 = vsel %vm1311_vm5, %v3500_v25, %v1582_v17 }
 0x28f   : > { %v1650_v14 = vmul.f32 %v1649_v44, %v1601_v19 }
 0x291   : > { %v1651_v23 = vadd.f32 %v1650_v14, %v1648_v40 }
 0x29c   : > { %v1586_v47 = vpop.permute.xlu2 %1585 }
 0x29d   : > { %v1603_v58 = vsel %vm1311_vm5, %v3502_v48, %v1586_v47 }
 0x29e   : > { %v1656_v0 = vmul.f32 %v1655_v42, %v1603_v58 }
 0x2a5   : > { %v1584_v12 = vpop.permute.xlu1 %1583 }
 0x2a6   : > { %v1602_v51 = vsel %vm1311_vm5, %v3501_v22, %v1584_v12 }
 0x2a7   : > { %v1653_v16 = vmul.f32 %v1652_v29, %v1602_v51 }
 0x2a9   : > { %v1654_v31 = vadd.f32 %v1653_v16, %v1651_v23 }
 0x2ab   : > { %v1657_v8 = vadd.f32 %v1656_v0, %v1654_v31 }
 0x2cc   : > { %v1588_v53 = vpop.permute.xlu0 %1587 }
 0x2cd   : > { %v1604_v21 = vsel %vm1311_vm5, %v2455_v24, %v1588_v53 }
 0x2ce   : > { %v1659_v39 = vmul.f32 %v1658_v5, %v1604_v21 }
 0x2d0   : > { %v1660_v36 = vadd.f32 %v1659_v39, %v1657_v8 }
 0x2d2   : > { %1827 = vmatmul.msk.f32.vlgmr.msra.gmra.mxu3 %vm1661_vm8, %v1660_v36 }
 0x355   : > { %v1682_v26 = vpop.f32.mrf.mxu3 }
 0x356   : > { %v1688_v61 = vperm.slane %v1682_v26, 0  ;;  %v1691_v35 = vperm.slane %v1682_v26, 1  ;;  %v1694_v63 = vperm.slane %v1682_v26, 2  ;;  %v1697_v24 = vperm.slane %v1682_v26, 3 }
 0x357   : > { %v1700_v9 = vperm.slane %v1682_v26, 4  ;;  %v1703_v20 = vperm.slane %v1682_v26, 5  ;;  %v1706_v4 = vperm.slane %v1682_v26, 6  ;;  %v1709_v6 = vperm.slane %v1682_v26, 7 }
 0x358   : > { %v1689_v7 = vmul.f32 %v1688_v61, %v1597_v45  ;;  %v1692_v52 = vmul.f32 %v1691_v35, %v1598_v41  ;;  %v1695_v43 = vmul.f32 %v1694_v63, %v1599_v62  ;;  %v1698_v27 = vmul.f32 %v1697_v24, %v1600_v49 }
 0x359   : > { %v1701_v33 = vmul.f32 %v1700_v9, %v1601_v19  ;;  %v1704_v30 = vmul.f32 %v1703_v20, %v1602_v51  ;;  %v1707_v57 = vmul.f32 %v1706_v4, %v1603_v58  ;;  %v1710_v41 = vmul.f32 %v1709_v6, %v1604_v21 }
 0x35a   : > { %v1690_v13 = vadd.f32 %v2033_v59, %v1689_v7 }
 0x35c   : > { %v1693_v60 = vadd.f32 %v1692_v52, %v1690_v13 }
 0x35e   : > { %v1696_v54 = vadd.f32 %v1695_v43, %v1693_v60 }
 0x360   : > { %v1699_v3 = vadd.f32 %v1698_v27, %v1696_v54 }
 0x362   : > { %v1702_v34 = vadd.f32 %v1701_v33, %v1699_v3 }
 0x364   : > { %v1705_v38 = vadd.f32 %v1704_v30, %v1702_v34 }
 0x366   : > { %v1708_v45 = vadd.f32 %v1707_v57, %v1705_v38 }
 0x368   : > { %v1711_v11 = vadd.f32 %v1710_v41, %v1708_v45 }
 0x36a   : > { %1712 = vst.msk [vmem:[%s338_s23] sm:$0xff] %vm1661_vm8, %v1711_v11 }
 0x36b   : > { %2062 = shalt.err (!%p2059_p3)
}
 0x36c   : > { %1856 = dma.vmem_to_hbm [thread:$0]  (%p2197_p5), %s1727_s25, 128, %s1729_s16, %s1714_s13  }
 0x36d PF: > { %p1862_p4 = scmp.ge.s32.totalorder %s2097_s12, 2  ;;  %s1740_s29 = sand.u32 1, %s2085_s30  }
 0x36e   : > { %s1741_s21 = scalar_lea.sflag [#allocation3], %s1740_s29 }
 0x36f   : > { %p1859_p7 = pnand %p1862_p4, %p2201_p6 }
 0x371   : > { %p1860_p8 = pneg %p1859_p7 }
 0x373   : > { %2080 = dma.done.wait (%p1860_p8), %s1741_s21, 128  }
 0x374   : > { %2082 = vsyncadd (%p1860_p8), %s1741_s21, 4294967168  ;;  %p19_p9 = scmp.ge.s32.totalorder %s2184_s15, 4   ;;  %s3503_s30 = smov %s2089_s10 }
 0x375   : > { %s3504_s10 = smov %s2093_s11  ;;  %s3505_s11 = smov %s2195_s18 }
 0x376   : > { %s3506_s12 = smov %s2184_s15  ;;  %21 = sbr.rel (!%p19_p9) target bundleno = 3 (0x3), region = 94 }
 0x37b   :  { %1747 = vsyncpa [#allocation3], 1 }
 0x37c   :  { %1749 = vsyncpa [#allocation3 + $0x1], 1 }

</bundles_post_ra>
